<compile_context>
chip_gen: v6e
topology: v6e:2x2x1
jax: 0.10.0
libtpu: 0.0.40
codegen_flags: <defaults>
</compile_context>

<pallas_src>
import functools

import numpy as np
import jax
import jax.numpy as jnp
from jax import lax
from jax.experimental import pallas as pl
from jax.experimental.pallas import tpu as pltpu


def _round_up(x, m):
    return ((x + m - 1) // m) * m


def _default_vmem_limit():
    # v7x: 64 MiB VMEM per TensorCore -> leave headroom for double buffers.
    # v5e / v6e: 128 MiB physical -> a larger limit lets bigger chunks resident.
    try:
        kind = jax.devices()[0].device_kind.lower()
        if "v5" in kind or "v6" in kind:
            return 96 * 1024 * 1024
    except Exception:
        pass
    return 48 * 1024 * 1024


def _choose_tiling(n, tile_i, chunk):
    """Pick (tile_i, chunk, n_pad, n_tiles, n_blocks).

    * >= 2 i-tiles so dimension_semantics=("parallel",) can shard across v7x's
      two TensorCores even for small systems.
    * The j/k chunk is a multiple of 128 (lane-aligned dynamic slices); a single
      chunk (== n_pad) is used when the whole padded system fits one block.
    * n_pad is a common multiple of tile_i and chunk so a single padded
      coordinate array serves both the i tiling and the j/k chunk loop.
    """
    if tile_i is None:
        tile_i = _round_up(max((n + 1) // 2, 8), 8) if n <= 128 else 64
    tile_i = _round_up(int(tile_i), 8)
    chunk = max(128, _round_up(int(chunk), 128))
    if _round_up(n, tile_i) <= chunk:
        n_pad = max(_round_up(n, tile_i), 2 * tile_i)
        chunk = n_pad                                   # single static j/k block
    else:
        m = int(np.lcm(tile_i, chunk))
        n_pad = _round_up(n, m)
    return tile_i, chunk, n_pad, n_pad // tile_i, n_pad // chunk


def _bpnn_kernel(ct_ref, cc_ref, d2s_ref, ejk_ref,
                 w1_ref, b1_ref, w2_ref, b2_ref, w3_ref, b3_ref,
                 out_ref, *scratch,
                 eta, r_cutoff, zeta, lamda, rs, tile, chunk, n_blocks):
    i0 = pl.program_id(0) * tile            # first global atom index of this tile

    cc = cc_ref[...]                        # (3, N) all coords, lane-dense
    n = cc.shape[1]
    ct = ct_ref[...]                        # (3, T) this tile's coords, lane-dense
    cx = jnp.transpose(ct[0:1, :])          # (T, 1) columns (one relayout per row)
    cy = jnp.transpose(ct[1:2, :])
    cz = jnp.transpose(ct[2:3, :])

    # -------- (T, N) pair planes for this i-tile -----------------------------
    dx = cx - cc[0:1, :]
    dy = cy - cc[1:2, :]
    dz = cz - cc[2:3, :]
    d2 = dx * dx + dy * dy + dz * dz
    d = jnp.sqrt(d2)
    fc = jnp.where(d <= r_cutoff,
                   0.5 * (jnp.cos((np.pi / r_cutoff) * d) + 1.0), 0.0)

    i_idx = i0 + lax.broadcasted_iota(jnp.int32, (tile, 1), 0)     # (T, 1)
    col = lax.broadcasted_iota(jnp.int32, (1, n), 1)               # (1, N)
    is_self = i_idx == col                                         # (T, N)
    not_self = jnp.where(is_self, 0.0, 1.0)

    # radial_G: sum_{j != i} exp(-eta (R_ij - Rs)^2) fc(R_ij)
    rad = jnp.sum(jnp.exp(-eta * (d - rs) ** 2) * fc * not_self,
                  axis=1, keepdims=True)                           # (T, 1)

    # E_ij = exp(-eta d^2) fc with the self column zeroed: every angular triple
    # with j == i or k == i vanishes through the product (no 3-D masks needed).
    e_it = jnp.exp(-eta * d2) * fc * not_self                      # (T, N)

    # 1/d at N^2 cost: EUP approx reciprocal + one Newton step (~f32 accurate).
    safe_d = jnp.where(is_self, 1.0, d)
    inv = pl.reciprocal(safe_d, approx=True)
    inv = inv * (2.0 - safe_d * inv)                               # (T, N)

    # 0.5*lamda folded into the squared distances once per plane, so the hot
    # per-triple code has no 0.5 / lamda multiplies.
    d2s = (0.5 * lamda) * d2                                       # (T, N)

    def ang_block(ejk, d2jk, e_j, d2_j, inv_j, e_k, d2_k, inv_k):
        # Rij . Rki = (|Rjk|^2 - |Rij|^2 - |Rki|^2) / 2   (prescaled by 0.5*lamda)
        num = d2jk[None, :, :] - d2_j[:, :, None] - d2_k[:, None, :]
        # clamp keeps log finite; exact for |lamda| < 1 (1 + lamda*cos > 0).
        base = jnp.maximum(1.0 + num * (inv_j[:, :, None] * inv_k[:, None, :]),
                           1e-12)
        term1 = jnp.exp(zeta * jnp.log(base))          # (1 + lamda cos)^zeta
        gi = term1 * (e_j[:, :, None] * ejk[None, :, :] * e_k[:, None, :])
        return jnp.sum(jnp.sum(gi, axis=2), axis=1, keepdims=True)   # (T, 1)

    if n_blocks == 1:
        # whole padded system fits a single (T, N, N) block
        ang = ang_block(ejk_ref[...], d2s_ref[...],
                        e_it, d2s, inv, e_it, d2s, inv)
    else:
        # j/k chunk loop: per-step VMEM ~ a few (T, C, C) temporaries, N-independent.
        # The k-block loop starts at the j-block (block-triangular skip, ~2x); the
        # diagonal block is handled by the k>j mask baked into E_jk by the wrapper.
        e_sc, d2_sc, inv_sc = scratch
        e_sc[...] = e_it
        d2_sc[...] = d2s
        inv_sc[...] = inv

        def jb_body(jb, acc):
            j0 = pl.multiple_of(jb * chunk, chunk)
            e_j = e_sc[:, pl.ds(j0, chunk)]
            d2_j = d2_sc[:, pl.ds(j0, chunk)]
            inv_j = inv_sc[:, pl.ds(j0, chunk)]

            def kb_body(kb, a):
                k0 = pl.multiple_of(kb * chunk, chunk)
                blk = ang_block(
                    ejk_ref[pl.ds(j0, chunk), pl.ds(k0, chunk)],
                    d2s_ref[pl.ds(j0, chunk), pl.ds(k0, chunk)],
                    e_j, d2_j, inv_j,
                    e_sc[:, pl.ds(k0, chunk)],
                    d2_sc[:, pl.ds(k0, chunk)],
                    inv_sc[:, pl.ds(k0, chunk)])
                return a + blk

            return lax.fori_loop(jb, n_blocks, kb_body, acc)

        ang = lax.fori_loop(0, n_blocks, jb_body,
                            jnp.zeros((tile, 1), jnp.float32))

    # -------- ElemNet MLPs: af(x) = 1 / (1 + x^2) -----------------------------
    def elem_net(net):
        w1 = w1_ref[net]                       # (2, 40)
        b1 = b1_ref[net]                       # (1, 40)
        w2 = w2_ref[net]                       # (40, 40)
        b2 = b2_ref[net]                       # (1, 40)
        w3 = w3_ref[net]                       # (1, 40)  (transposed in wrapper)
        b3 = b3_ref[net]                       # (1, 1)
        pre1 = ang * w1[0:1, :] + rad * w1[1:2, :] + b1            # (T, 40)
        h1 = 1.0 / (1.0 + pre1 * pre1)
        pre2 = jnp.dot(h1, w2, preferred_element_type=jnp.float32) + b2
        h2 = 1.0 / (1.0 + pre2 * pre2)
        # 40 -> 1 layer on the VPU (lane reduce) instead of a 1-column MXU matmul
        return jnp.sum(h2 * w3, axis=1, keepdims=True) + b3        # (T, 1)

    y1 = elem_net(0)
    out_ref[...] = jnp.transpose(y1)           # lane-dense (1, T) store

    # atom index 8 uses elem2 -> only run it on the tile containing atom 8
    @pl.when(jnp.logical_and(i0 <= 8, 8 < i0 + tile))
    def _():
        y2 = elem_net(1)
        out_ref[...] = jnp.transpose(jnp.where(i_idx == 8, y2, y1))


def bpnn_elec_forward(coords, params, *, eta, r_cutoff, zeta, lamda, rs,
                      tile_i=None, chunk=128, vmem_limit_bytes=None):
    coords = jnp.asarray(coords, jnp.float32)
    n = coords.shape[0]
    tile_i, chunk, n_pad, n_tiles, n_blocks = _choose_tiling(n, tile_i, chunk)
    if vmem_limit_bytes is None:
        vmem_limit_bytes = _default_vmem_limit()

    # ---- pad with far-away ghost atoms (fc = 0 -> contribute exactly zero) ---
    if n_pad > n:
        far = (jnp.max(coords) + 10.0 * r_cutoff
               + 3.0 * r_cutoff * jnp.arange(1, n_pad - n + 1, dtype=jnp.float32))
        coords_p = jnp.concatenate([coords, jnp.stack([far, far, far], axis=1)],
                                   axis=0)
    else:
        coords_p = coords
    coords_t = jnp.transpose(coords_p)                             # (3, N_pad)
    coords_tiles = coords_t.reshape(3, n_tiles, tile_i).transpose(1, 0, 2)

    # ---- hoisted j/k plane: 0.5*lamda-prescaled d^2 and the prescaled, masked
    # E_jk = 2^(1-zeta) * exp(-eta d^2) * fc, zeroed for k <= j -> the kernel's
    # diagonal chunk needs no extra mask and k<j blocks are skipped entirely.
    diff = coords_p[:, None, :] - coords_p[None, :, :]
    d2_jk = jnp.sum(diff * diff, axis=-1)
    d_jk = jnp.sqrt(d2_jk)
    fc_jk = jnp.where(d_jk <= r_cutoff,
                      0.5 * (jnp.cos(np.pi * d_jk / r_cutoff) + 1.0), 0.0)
    tri = jnp.arange(n_pad)[None, :] > jnp.arange(n_pad)[:, None]
    e_jk = jnp.where(tri, (2.0 ** (1.0 - zeta)) * jnp.exp(-eta * d2_jk) * fc_jk,
                     0.0).astype(jnp.float32)
    d2s_jk = ((0.5 * lamda) * d2_jk).astype(jnp.float32)

    w3r = jnp.transpose(params["w3"], (0, 2, 1))                   # (2, 1, 40)

    kernel = functools.partial(
        _bpnn_kernel, eta=float(eta), r_cutoff=float(r_cutoff),
        zeta=float(zeta), lamda=float(lamda), rs=float(rs),
        tile=tile_i, chunk=chunk, n_blocks=n_blocks)

    def _full(arr):
        nd = arr.ndim
        return pl.BlockSpec(arr.shape, lambda t, _nd=nd: (0,) * _nd)

    in_specs = [
        pl.BlockSpec((None, 3, tile_i), lambda t: (t, 0, 0)),  # this tile's coords
        _full(coords_t),                                       # (3, N) all coords
        _full(d2s_jk), _full(e_jk),                            # hoisted j/k planes
        _full(params["w1"]), _full(params["b1"]),
        _full(params["w2"]), _full(params["b2"]),
        _full(w3r), _full(params["b3"]),
    ]
    scratch = ([] if n_blocks == 1 else
               [pltpu.VMEM((tile_i, n_pad), jnp.float32) for _ in range(3)])

    out = pl.pallas_call(
        kernel,
        out_shape=jax.ShapeDtypeStruct((n_tiles, 1, tile_i), jnp.float32),
        grid=(n_tiles,),
        in_specs=in_specs,
        out_specs=pl.BlockSpec((None, 1, tile_i), lambda t: (t, 0, 0)),
        scratch_shapes=scratch,
        compiler_params=pltpu.CompilerParams(
            dimension_semantics=("parallel",),     # shard i-tiles across TCs (v7x)
            vmem_limit_bytes=int(vmem_limit_bytes)),
    )(coords_tiles, coords_t, d2s_jk, e_jk,
      params["w1"], params["b1"], params["w2"], params["b2"], w3r, params["b3"])
    return out.reshape(-1)[:n]


def init_params(key):
    """Deterministic init for the two stacked ElemNets (PyTorch-Linear-style)."""
    keys = jax.random.split(key, 12)

    def linear(kw, kb, fan_in, fan_out):
        bound = 1.0 / np.sqrt(fan_in)
        w = jax.random.uniform(kw, (fan_in, fan_out), jnp.float32, -bound, bound)
        b = jax.random.uniform(kb, (1, fan_out), jnp.float32, -bound, bound)
        return w, b

    w1s, b1s, w2s, b2s, w3s, b3s = [], [], [], [], [], []
    for net in range(2):
        k = keys[6 * net:6 * (net + 1)]
        w1, b1 = linear(k[0], k[1], 2, 40)
        w2, b2 = linear(k[2], k[3], 40, 40)
        w3, b3 = linear(k[4], k[5], 40, 1)
        w1s.append(w1); b1s.append(b1)
        w2s.append(w2); b2s.append(b2)
        w3s.append(w3); b3s.append(b3)
    return dict(w1=jnp.stack(w1s), b1=jnp.stack(b1s),
                w2=jnp.stack(w2s), b2=jnp.stack(b2s),
                w3=jnp.stack(w3s), b3=jnp.stack(b3s))


def reference_forward(coords, params, *, eta, r_cutoff, zeta, lamda, rs):
    """Float64 NumPy reference mirroring the PyTorch loops exactly (small N)."""
    coords = np.asarray(coords, np.float64)
    p = {k: np.asarray(v, np.float64) for k, v in params.items()}
    N = coords.shape[0]

    def fc(r):
        return 0.5 * (np.cos(np.pi * r / r_cutoff) + 1.0) if r <= r_cutoff else 0.0

    def af(v):
        return 1.0 / (1.0 + v ** 2)

    def elem(net, g):
        h = af(g @ p["w1"][net] + p["b1"][net][0])
        h = af(h @ p["w2"][net] + p["b2"][net][0])
        return (h @ p["w3"][net] + p["b3"][net][0])[0]

    out = []
    for i in range(N):
        rad = 0.0
        for j in range(N):
            if i == j:
                continue
            r = np.linalg.norm(coords[i] - coords[j])
            rad += np.exp(-eta * (r - rs) ** 2) * fc(r)
        ang = 0.0
        for j in range(N):
            for k in range(j + 1, N):
                if i == j or i == k:
                    continue
                Rij = coords[i] - coords[j]
                Rjk = coords[j] - coords[k]
                Rki = coords[k] - coords[i]
                rij, rjk, rki = map(np.linalg.norm, (Rij, Rjk, Rki))
                cos_t = np.dot(Rij, Rki) / (rij * rki)
                t1 = (1.0 + lamda * cos_t) ** zeta
                t2 = np.exp(-eta * (rij ** 2 + rjk ** 2 + rki ** 2))
                t2 *= fc(rij) * fc(rjk) * fc(rki)
                ang += t1 * t2
        ang *= 2.0 ** (1.0 - zeta)
        g = np.array([ang, rad])
        out.append(elem(1 if i == 8 else 0, g))
    return np.array(out)


def reference_vectorized(coords, params, *, eta, r_cutoff, zeta, lamda, rs):
    """Vectorized float64 NumPy reference (O(N^3) memory) for larger systems."""
    c = np.asarray(coords, np.float64)
    p = {k: np.asarray(v, np.float64) for k, v in params.items()}
    n = c.shape[0]
    diff = c[:, None, :] - c[None, :, :]
    d2 = np.sum(diff * diff, axis=-1)
    d = np.sqrt(d2)
    fc = np.where(d <= r_cutoff, 0.5 * (np.cos(np.pi * d / r_cutoff) + 1.0), 0.0)
    eye = np.eye(n)
    off = 1.0 - eye
    rad = np.sum(np.exp(-eta * (d - rs) ** 2) * fc * off, axis=1)
    E = np.exp(-eta * d2) * fc
    E_i = E * off
    inv = off / np.where(eye > 0, 1.0, d)
    tri = (np.arange(n)[None, :] > np.arange(n)[:, None]).astype(np.float64)
    E_tri = E * tri
    cos = ((d2[None, :, :] - d2[:, :, None] - d2[:, None, :]) * 0.5
           * inv[:, :, None] * inv[:, None, :])
    t1 = np.maximum(1.0 + lamda * cos, 1e-12) ** zeta
    w = E_i[:, :, None] * E_tri[None, :, :] * E_i[:, None, :]
    ang = (2.0 ** (1.0 - zeta)) * np.sum(t1 * w, axis=(1, 2))
    G = np.stack([ang, rad], axis=1)

    def net(idx):
        h = 1.0 / (1.0 + (G @ p["w1"][idx] + p["b1"][idx][0]) ** 2)
        h = 1.0 / (1.0 + (h @ p["w2"][idx] + p["b2"][idx][0]) ** 2)
        return (h @ p["w3"][idx] + p["b3"][idx][0])[:, 0]

    return np.where(np.arange(n) == 8, net(1), net(0))


if __name__ == "__main__":
    # hyperparameters of BPNN_Elec_Net(eta, R_cutoff, zeta, lamda, Rs)
    hp = dict(eta=0.5, r_cutoff=3.0, zeta=0.6, lamda=0.8, rs=0.5)

    key = jax.random.PRNGKey(0)
    k_c1, k_c2, k_params = jax.random.split(key, 3)
    params = init_params(k_params)

    # --- small system (n=16 > 8 so elem2 is used): exact loop reference,
    #     exercises the single-chunk path and the 2-tile small-n split. --------
    n_small = 16
    coords_s = jax.random.uniform(k_c1, (n_small, 3), jnp.float32,
                                  minval=0.0, maxval=2.0)
    qi_s = jax.block_until_ready(bpnn_elec_forward(coords_s, params, **hp))
    ref_s = reference_forward(np.asarray(coords_s), params, **hp)
    assert qi_s.shape == (n_small,)
    assert np.all(np.isfinite(np.asarray(qi_s)))
    np.testing.assert_allclose(np.asarray(qi_s), ref_s, rtol=1e-3, atol=1e-3)

    # --- larger system: exercises the chunked, block-triangular j/k loop path -
    n_big = 150
    coords_b = jax.random.uniform(k_c2, (n_big, 3), jnp.float32,
                                  minval=0.0, maxval=10.0)
    qi_b = jax.block_until_ready(bpnn_elec_forward(coords_b, params, **hp))
    ref_b = reference_vectorized(np.asarray(coords_b), params, **hp)
    assert qi_b.shape == (n_big,)
    assert np.all(np.isfinite(np.asarray(qi_b)))
    np.testing.assert_allclose(np.asarray(qi_b), ref_b, rtol=2e-3, atol=2e-3)

    print("KERNEL_OK")
</pallas_src>

<mosaic_0001>
module attributes {stable_mosaic.version = 11 : i64} {
  func.func @_bpnn_kernel(%arg0: i32, %arg1: memref<1x3x8xf32, #tpu.memory_space<vmem>>, %arg2: memref<3x16xf32, #tpu.memory_space<vmem>>, %arg3: memref<16x16xf32, #tpu.memory_space<vmem>>, %arg4: memref<16x16xf32, #tpu.memory_space<vmem>>, %arg5: memref<2x2x40xf32, #tpu.memory_space<vmem>>, %arg6: memref<2x1x40xf32, #tpu.memory_space<vmem>>, %arg7: memref<2x40x40xf32, #tpu.memory_space<vmem>>, %arg8: memref<2x1x40xf32, #tpu.memory_space<vmem>>, %arg9: memref<2x1x40xf32, #tpu.memory_space<vmem>>, %arg10: memref<2x1x1xf32, #tpu.memory_space<vmem>>, %arg11: memref<1x1x8xf32, #tpu.memory_space<vmem>>) attributes {dimension_semantics = [#tpu.dimension_semantics<parallel>], iteration_bounds = array<i64: 2>, scalar_prefetch = 0 : i64, scratch_operands = 0 : i64, tpu.core_type = #tpu.core_type<tc>, window_params = [{transform_indices = @transform_0, window_bounds = array<i64: 1, 3, 8>}, {pipeline_mode = #tpu.pipeline_mode<synchronous>, transform_indices = @transform_1, window_bounds = array<i64: 3, 16>}, {pipeline_mode = #tpu.pipeline_mode<synchronous>, transform_indices = @transform_2, window_bounds = array<i64: 16, 16>}, {pipeline_mode = #tpu.pipeline_mode<synchronous>, transform_indices = @transform_3, window_bounds = array<i64: 16, 16>}, {pipeline_mode = #tpu.pipeline_mode<synchronous>, transform_indices = @transform_4, window_bounds = array<i64: 2, 2, 40>}, {pipeline_mode = #tpu.pipeline_mode<synchronous>, transform_indices = @transform_5, window_bounds = array<i64: 2, 1, 40>}, {pipeline_mode = #tpu.pipeline_mode<synchronous>, transform_indices = @transform_6, window_bounds = array<i64: 2, 40, 40>}, {pipeline_mode = #tpu.pipeline_mode<synchronous>, transform_indices = @transform_7, window_bounds = array<i64: 2, 1, 40>}, {pipeline_mode = #tpu.pipeline_mode<synchronous>, transform_indices = @transform_8, window_bounds = array<i64: 2, 1, 40>}, {pipeline_mode = #tpu.pipeline_mode<synchronous>, transform_indices = @transform_9, window_bounds = array<i64: 2, 1, 1>}, {transform_indices = @transform_10, window_bounds = array<i64: 1, 1, 8>}]} {
    %c8_i32 = arith.constant 8 : i32
    %0 = arith.muli %arg0, %c8_i32 : i32
    %c0 = arith.constant 0 : index
    %c0_0 = arith.constant 0 : index
    %1 = vector.load %arg2[%c0, %c0_0] : memref<3x16xf32, #tpu.memory_space<vmem>>, vector<3x16xf32>
    %c0_1 = arith.constant 0 : index
    %c0_2 = arith.constant 0 : index
    %c0_3 = arith.constant 0 : index
    %2 = vector.load %arg1[%c0_1, %c0_2, %c0_3] : memref<1x3x8xf32, #tpu.memory_space<vmem>>, vector<1x3x8xf32>
    %3 = vector.shape_cast %2 : vector<1x3x8xf32> to vector<3x8xf32>
    %4 = vector.extract_strided_slice %3 {offsets = [0, 0], sizes = [1, 8], strides = [1, 1]} : vector<3x8xf32> to vector<1x8xf32>
    %5 = tpu.transpose %4, [1, 0] : vector<1x8xf32> -> vector<8x1xf32>
    %6 = vector.extract_strided_slice %3 {offsets = [1, 0], sizes = [1, 8], strides = [1, 1]} : vector<3x8xf32> to vector<1x8xf32>
    %7 = tpu.transpose %6, [1, 0] : vector<1x8xf32> -> vector<8x1xf32>
    %8 = vector.extract_strided_slice %3 {offsets = [2, 0], sizes = [1, 8], strides = [1, 1]} : vector<3x8xf32> to vector<1x8xf32>
    %9 = tpu.transpose %8, [1, 0] : vector<1x8xf32> -> vector<8x1xf32>
    %10 = vector.extract_strided_slice %1 {offsets = [0, 0], sizes = [1, 16], strides = [1, 1]} : vector<3x16xf32> to vector<1x16xf32>
    %11 = vector.broadcast %5 : vector<8x1xf32> to vector<8x16xf32>
    %12 = vector.broadcast %10 : vector<1x16xf32> to vector<8x16xf32>
    %13 = arith.subf %11, %12 : vector<8x16xf32>
    %14 = vector.extract_strided_slice %1 {offsets = [1, 0], sizes = [1, 16], strides = [1, 1]} : vector<3x16xf32> to vector<1x16xf32>
    %15 = vector.broadcast %7 : vector<8x1xf32> to vector<8x16xf32>
    %16 = vector.broadcast %14 : vector<1x16xf32> to vector<8x16xf32>
    %17 = arith.subf %15, %16 : vector<8x16xf32>
    %18 = vector.extract_strided_slice %1 {offsets = [2, 0], sizes = [1, 16], strides = [1, 1]} : vector<3x16xf32> to vector<1x16xf32>
    %19 = vector.broadcast %9 : vector<8x1xf32> to vector<8x16xf32>
    %20 = vector.broadcast %18 : vector<1x16xf32> to vector<8x16xf32>
    %21 = arith.subf %19, %20 : vector<8x16xf32>
    %22 = arith.mulf %13, %13 : vector<8x16xf32>
    %23 = arith.mulf %17, %17 : vector<8x16xf32>
    %24 = arith.addf %22, %23 : vector<8x16xf32>
    %25 = arith.mulf %21, %21 : vector<8x16xf32>
    %26 = arith.addf %24, %25 : vector<8x16xf32>
    %27 = math.sqrt %26 : vector<8x16xf32>
    %cst = arith.constant 3.000000e+00 : f32
    %28 = vector.broadcast %cst : f32 to vector<8x16xf32>
    %29 = arith.cmpf ole, %27, %28 : vector<8x16xf32>
    %cst_4 = arith.constant 1.04719758 : f32
    %30 = vector.broadcast %cst_4 : f32 to vector<8x16xf32>
    %31 = arith.mulf %30, %27 : vector<8x16xf32>
    %32 = math.cos %31 : vector<8x16xf32>
    %cst_5 = arith.constant 1.000000e+00 : f32
    %33 = vector.broadcast %cst_5 : f32 to vector<8x16xf32>
    %34 = arith.addf %32, %33 : vector<8x16xf32>
    %cst_6 = arith.constant 5.000000e-01 : f32
    %35 = vector.broadcast %cst_6 : f32 to vector<8x16xf32>
    %36 = arith.mulf %35, %34 : vector<8x16xf32>
    %cst_7 = arith.constant 0.000000e+00 : f32
    %37 = vector.broadcast %cst_7 : f32 to vector<8x16xf32>
    %38 = arith.select %29, %36, %37 : vector<8x16xi1>, vector<8x16xf32>
    %39 = tpu.iota {dimensions = array<i32: 0>} : vector<8x1xi32>
    %40 = vector.broadcast %0 : i32 to vector<8x1xi32>
    %41 = arith.addi %40, %39 : vector<8x1xi32>
    %42 = tpu.iota {dimensions = array<i32: 1>} : vector<1x16xi32>
    %43 = vector.broadcast %41 : vector<8x1xi32> to vector<8x16xi32>
    %44 = vector.broadcast %42 : vector<1x16xi32> to vector<8x16xi32>
    %45 = arith.cmpi eq, %43, %44 : vector<8x16xi32>
    %cst_8 = arith.constant 0.000000e+00 : f32
    %cst_9 = arith.constant 1.000000e+00 : f32
    %46 = vector.broadcast %cst_8 : f32 to vector<8x16xf32>
    %47 = vector.broadcast %cst_9 : f32 to vector<8x16xf32>
    %48 = arith.select %45, %46, %47 : vector<8x16xi1>, vector<8x16xf32>
    %cst_10 = arith.constant 5.000000e-01 : f32
    %49 = vector.broadcast %cst_10 : f32 to vector<8x16xf32>
    %50 = arith.subf %27, %49 : vector<8x16xf32>
    %51 = arith.mulf %50, %50 : vector<8x16xf32>
    %cst_11 = arith.constant -5.000000e-01 : f32
    %52 = vector.broadcast %cst_11 : f32 to vector<8x16xf32>
    %53 = arith.mulf %52, %51 : vector<8x16xf32>
    %54 = math.exp %53 : vector<8x16xf32>
    %55 = arith.mulf %54, %38 : vector<8x16xf32>
    %56 = arith.mulf %55, %48 : vector<8x16xf32>
    %cst_12 = arith.constant dense<0.000000e+00> : vector<8xf32>
    %57 = vector.multi_reduction <add>, %56, %cst_12 [1] : vector<8x16xf32> to vector<8xf32>
    %58 = vector.shape_cast %57 : vector<8xf32> to vector<8x1xf32>
    %cst_13 = arith.constant -5.000000e-01 : f32
    %59 = vector.broadcast %cst_13 : f32 to vector<8x16xf32>
    %60 = arith.mulf %59, %26 : vector<8x16xf32>
    %61 = math.exp %60 : vector<8x16xf32>
    %62 = arith.mulf %61, %38 : vector<8x16xf32>
    %63 = arith.mulf %62, %48 : vector<8x16xf32>
    %cst_14 = arith.constant 1.000000e+00 : f32
    %64 = vector.broadcast %cst_14 : f32 to vector<8x16xf32>
    %65 = arith.select %45, %64, %27 : vector<8x16xi1>, vector<8x16xf32>
    %66 = tpu.reciprocal %65 {approx = true} : vector<8x16xf32> -> vector<8x16xf32>
    %67 = arith.mulf %65, %66 : vector<8x16xf32>
    %cst_15 = arith.constant 2.000000e+00 : f32
    %68 = vector.broadcast %cst_15 : f32 to vector<8x16xf32>
    %69 = arith.subf %68, %67 : vector<8x16xf32>
    %70 = arith.mulf %66, %69 : vector<8x16xf32>
    %cst_16 = arith.constant 4.000000e-01 : f32
    %71 = vector.broadcast %cst_16 : f32 to vector<8x16xf32>
    %72 = arith.mulf %71, %26 : vector<8x16xf32>
    %c0_17 = arith.constant 0 : index
    %c0_18 = arith.constant 0 : index
    %73 = vector.load %arg4[%c0_17, %c0_18] : memref<16x16xf32, #tpu.memory_space<vmem>>, vector<16x16xf32>
    %c0_19 = arith.constant 0 : index
    %c0_20 = arith.constant 0 : index
    %74 = vector.load %arg3[%c0_19, %c0_20] : memref<16x16xf32, #tpu.memory_space<vmem>>, vector<16x16xf32>
    %75 = vector.shape_cast %74 : vector<16x16xf32> to vector<1x16x16xf32>
    %76 = vector.shape_cast %72 : vector<8x16xf32> to vector<8x16x1xf32>
    %77 = vector.broadcast %75 : vector<1x16x16xf32> to vector<8x16x16xf32>
    %78 = vector.broadcast %76 : vector<8x16x1xf32> to vector<8x16x16xf32>
    %79 = arith.subf %77, %78 : vector<8x16x16xf32>
    %80 = vector.shape_cast %72 : vector<8x16xf32> to vector<8x1x16xf32>
    %81 = vector.broadcast %80 : vector<8x1x16xf32> to vector<8x16x16xf32>
    %82 = arith.subf %79, %81 : vector<8x16x16xf32>
    %83 = vector.shape_cast %70 : vector<8x16xf32> to vector<8x16x1xf32>
    %84 = vector.shape_cast %70 : vector<8x16xf32> to vector<8x1x16xf32>
    %85 = vector.broadcast %83 : vector<8x16x1xf32> to vector<8x16x16xf32>
    %86 = vector.broadcast %84 : vector<8x1x16xf32> to vector<8x16x16xf32>
    %87 = arith.mulf %85, %86 : vector<8x16x16xf32>
    %88 = arith.mulf %82, %87 : vector<8x16x16xf32>
    %cst_21 = arith.constant 1.000000e+00 : f32
    %89 = vector.broadcast %cst_21 : f32 to vector<8x16x16xf32>
    %90 = arith.addf %89, %88 : vector<8x16x16xf32>
    %cst_22 = arith.constant 9.99999996E-13 : f32
    %91 = vector.broadcast %cst_22 : f32 to vector<8x16x16xf32>
    %92 = arith.maximumf %90, %91 : vector<8x16x16xf32>
    %93 = math.log %92 : vector<8x16x16xf32>
    %cst_23 = arith.constant 6.000000e-01 : f32
    %94 = vector.broadcast %cst_23 : f32 to vector<8x16x16xf32>
    %95 = arith.mulf %94, %93 : vector<8x16x16xf32>
    %96 = math.exp %95 : vector<8x16x16xf32>
    %97 = vector.shape_cast %63 : vector<8x16xf32> to vector<8x16x1xf32>
    %98 = vector.shape_cast %73 : vector<16x16xf32> to vector<1x16x16xf32>
    %99 = vector.broadcast %97 : vector<8x16x1xf32> to vector<8x16x16xf32>
    %100 = vector.broadcast %98 : vector<1x16x16xf32> to vector<8x16x16xf32>
    %101 = arith.mulf %99, %100 : vector<8x16x16xf32>
    %102 = vector.shape_cast %63 : vector<8x16xf32> to vector<8x1x16xf32>
    %103 = vector.broadcast %102 : vector<8x1x16xf32> to vector<8x16x16xf32>
    %104 = arith.mulf %101, %103 : vector<8x16x16xf32>
    %105 = arith.mulf %96, %104 : vector<8x16x16xf32>
    %cst_24 = arith.constant dense<0.000000e+00> : vector<8x16xf32>
    %106 = vector.multi_reduction <add>, %105, %cst_24 [2] : vector<8x16x16xf32> to vector<8x16xf32>
    %cst_25 = arith.constant dense<0.000000e+00> : vector<8xf32>
    %107 = vector.multi_reduction <add>, %106, %cst_25 [1] : vector<8x16xf32> to vector<8xf32>
    %108 = vector.shape_cast %107 : vector<8xf32> to vector<8x1xf32>
    %c0_26 = arith.constant 0 : index
    %c0_27 = arith.constant 0 : index
    %c0_28 = arith.constant 0 : index
    %109 = vector.load %arg5[%c0_26, %c0_27, %c0_28] : memref<2x2x40xf32, #tpu.memory_space<vmem>>, vector<1x2x40xf32>
    %110 = vector.shape_cast %109 : vector<1x2x40xf32> to vector<2x40xf32>
    %c0_29 = arith.constant 0 : index
    %c0_30 = arith.constant 0 : index
    %c0_31 = arith.constant 0 : index
    %111 = vector.load %arg6[%c0_29, %c0_30, %c0_31] : memref<2x1x40xf32, #tpu.memory_space<vmem>>, vector<1x1x40xf32>
    %112 = vector.shape_cast %111 : vector<1x1x40xf32> to vector<1x40xf32>
    %c0_32 = arith.constant 0 : index
    %c0_33 = arith.constant 0 : index
    %c0_34 = arith.constant 0 : index
    %113 = vector.load %arg7[%c0_32, %c0_33, %c0_34] : memref<2x40x40xf32, #tpu.memory_space<vmem>>, vector<1x40x40xf32>
    %114 = vector.shape_cast %113 : vector<1x40x40xf32> to vector<40x40xf32>
    %c0_35 = arith.constant 0 : index
    %c0_36 = arith.constant 0 : index
    %c0_37 = arith.constant 0 : index
    %115 = vector.load %arg8[%c0_35, %c0_36, %c0_37] : memref<2x1x40xf32, #tpu.memory_space<vmem>>, vector<1x1x40xf32>
    %116 = vector.shape_cast %115 : vector<1x1x40xf32> to vector<1x40xf32>
    %c0_38 = arith.constant 0 : index
    %c0_39 = arith.constant 0 : index
    %c0_40 = arith.constant 0 : index
    %117 = vector.load %arg9[%c0_38, %c0_39, %c0_40] : memref<2x1x40xf32, #tpu.memory_space<vmem>>, vector<1x1x40xf32>
    %118 = vector.shape_cast %117 : vector<1x1x40xf32> to vector<1x40xf32>
    %c0_41 = arith.constant 0 : index
    %c0_42 = arith.constant 0 : index
    %c0_43 = arith.constant 0 : index
    %119 = vector.load %arg10[%c0_41, %c0_42, %c0_43] : memref<2x1x1xf32, #tpu.memory_space<vmem>>, vector<1x1x1xf32>
    %120 = vector.shape_cast %119 : vector<1x1x1xf32> to vector<1x1xf32>
    %121 = vector.extract_strided_slice %110 {offsets = [0, 0], sizes = [1, 40], strides = [1, 1]} : vector<2x40xf32> to vector<1x40xf32>
    %122 = vector.broadcast %108 : vector<8x1xf32> to vector<8x40xf32>
    %123 = vector.broadcast %121 : vector<1x40xf32> to vector<8x40xf32>
    %124 = arith.mulf %122, %123 : vector<8x40xf32>
    %125 = vector.extract_strided_slice %110 {offsets = [1, 0], sizes = [1, 40], strides = [1, 1]} : vector<2x40xf32> to vector<1x40xf32>
    %126 = vector.broadcast %58 : vector<8x1xf32> to vector<8x40xf32>
    %127 = vector.broadcast %125 : vector<1x40xf32> to vector<8x40xf32>
    %128 = arith.mulf %126, %127 : vector<8x40xf32>
    %129 = arith.addf %124, %128 : vector<8x40xf32>
    %130 = vector.broadcast %112 : vector<1x40xf32> to vector<8x40xf32>
    %131 = arith.addf %129, %130 : vector<8x40xf32>
    %132 = arith.mulf %131, %131 : vector<8x40xf32>
    %cst_44 = arith.constant 1.000000e+00 : f32
    %133 = vector.broadcast %cst_44 : f32 to vector<8x40xf32>
    %134 = arith.addf %133, %132 : vector<8x40xf32>
    %cst_45 = arith.constant 1.000000e+00 : f32
    %135 = vector.broadcast %cst_45 : f32 to vector<8x40xf32>
    %136 = arith.divf %135, %134 : vector<8x40xf32>
    %cst_46 = arith.constant dense<0.000000e+00> : vector<8x40xf32>
    %137 = tpu.matmul %136, %114, %cst_46 {dimension_numbers = #tpu.dot_dimension_numbers<[1], [0], [0], [1], [0, 0, 1, 1], [], []>} : vector<8x40xf32>, vector<40x40xf32>, vector<8x40xf32> -> vector<8x40xf32>
    %138 = vector.broadcast %116 : vector<1x40xf32> to vector<8x40xf32>
    %139 = arith.addf %137, %138 : vector<8x40xf32>
    %140 = arith.mulf %139, %139 : vector<8x40xf32>
    %cst_47 = arith.constant 1.000000e+00 : f32
    %141 = vector.broadcast %cst_47 : f32 to vector<8x40xf32>
    %142 = arith.addf %141, %140 : vector<8x40xf32>
    %cst_48 = arith.constant 1.000000e+00 : f32
    %143 = vector.broadcast %cst_48 : f32 to vector<8x40xf32>
    %144 = arith.divf %143, %142 : vector<8x40xf32>
    %145 = vector.broadcast %118 : vector<1x40xf32> to vector<8x40xf32>
    %146 = arith.mulf %144, %145 : vector<8x40xf32>
    %cst_49 = arith.constant dense<0.000000e+00> : vector<8xf32>
    %147 = vector.multi_reduction <add>, %146, %cst_49 [1] : vector<8x40xf32> to vector<8xf32>
    %148 = vector.shape_cast %147 : vector<8xf32> to vector<8x1xf32>
    %149 = vector.broadcast %120 : vector<1x1xf32> to vector<8x1xf32>
    %150 = arith.addf %148, %149 : vector<8x1xf32>
    %151 = tpu.transpose %150, [1, 0] : vector<8x1xf32> -> vector<1x8xf32>
    %c0_50 = arith.constant 0 : index
    %c0_51 = arith.constant 0 : index
    %c0_52 = arith.constant 0 : index
    %152 = vector.load %arg11[%c0_50, %c0_51, %c0_52] : memref<1x1x8xf32, #tpu.memory_space<vmem>>, vector<1x1x8xf32>
    %153 = vector.shape_cast %152 : vector<1x1x8xf32> to vector<1x8xf32>
    %154 = vector.shape_cast %151 : vector<1x8xf32> to vector<1x1x8xf32>
    tpu.vector_store %arg11[%c0_50, %c0_51, %c0_52], %154 {strides = array<i32>} : memref<1x1x8xf32, #tpu.memory_space<vmem>>, vector<1x1x8xf32>,
    %c8_i32_53 = arith.constant 8 : i32
    %155 = arith.cmpi sle, %0, %c8_i32_53 : i32
    %c8_i32_54 = arith.constant 8 : i32
    %156 = arith.addi %0, %c8_i32_54 : i32
    %c8_i32_55 = arith.constant 8 : i32
    %157 = arith.cmpi sgt, %156, %c8_i32_55 : i32
    %158 = arith.andi %155, %157 : i1
    %159 = arith.extui %158 : i1 to i32
    %c0_i32 = arith.constant 0 : i32
    %160 = arith.cmpi ne, %159, %c0_i32 : i32
    scf.if %160 {
      %c1 = arith.constant 1 : index
      %c0_56 = arith.constant 0 : index
      %c0_57 = arith.constant 0 : index
      %161 = vector.load %arg5[%c1, %c0_56, %c0_57] : memref<2x2x40xf32, #tpu.memory_space<vmem>>, vector<1x2x40xf32>
      %162 = vector.shape_cast %161 : vector<1x2x40xf32> to vector<2x40xf32>
      %c1_58 = arith.constant 1 : index
      %c0_59 = arith.constant 0 : index
      %c0_60 = arith.constant 0 : index
      %163 = vector.load %arg6[%c1_58, %c0_59, %c0_60] : memref<2x1x40xf32, #tpu.memory_space<vmem>>, vector<1x1x40xf32>
      %164 = vector.shape_cast %163 : vector<1x1x40xf32> to vector<1x40xf32>
      %c1_61 = arith.constant 1 : index
      %c0_62 = arith.constant 0 : index
      %c0_63 = arith.constant 0 : index
      %165 = vector.load %arg7[%c1_61, %c0_62, %c0_63] : memref<2x40x40xf32, #tpu.memory_space<vmem>>, vector<1x40x40xf32>
      %166 = vector.shape_cast %165 : vector<1x40x40xf32> to vector<40x40xf32>
      %c1_64 = arith.constant 1 : index
      %c0_65 = arith.constant 0 : index
      %c0_66 = arith.constant 0 : index
      %167 = vector.load %arg8[%c1_64, %c0_65, %c0_66] : memref<2x1x40xf32, #tpu.memory_space<vmem>>, vector<1x1x40xf32>
      %168 = vector.shape_cast %167 : vector<1x1x40xf32> to vector<1x40xf32>
      %c1_67 = arith.constant 1 : index
      %c0_68 = arith.constant 0 : index
      %c0_69 = arith.constant 0 : index
      %169 = vector.load %arg9[%c1_67, %c0_68, %c0_69] : memref<2x1x40xf32, #tpu.memory_space<vmem>>, vector<1x1x40xf32>
      %170 = vector.shape_cast %169 : vector<1x1x40xf32> to vector<1x40xf32>
      %c1_70 = arith.constant 1 : index
      %c0_71 = arith.constant 0 : index
      %c0_72 = arith.constant 0 : index
      %171 = vector.load %arg10[%c1_70, %c0_71, %c0_72] : memref<2x1x1xf32, #tpu.memory_space<vmem>>, vector<1x1x1xf32>
      %172 = vector.shape_cast %171 : vector<1x1x1xf32> to vector<1x1xf32>
      %173 = vector.extract_strided_slice %162 {offsets = [0, 0], sizes = [1, 40], strides = [1, 1]} : vector<2x40xf32> to vector<1x40xf32>
      %174 = vector.broadcast %108 : vector<8x1xf32> to vector<8x40xf32>
      %175 = vector.broadcast %173 : vector<1x40xf32> to vector<8x40xf32>
      %176 = arith.mulf %174, %175 : vector<8x40xf32>
      %177 = vector.extract_strided_slice %162 {offsets = [1, 0], sizes = [1, 40], strides = [1, 1]} : vector<2x40xf32> to vector<1x40xf32>
      %178 = vector.broadcast %58 : vector<8x1xf32> to vector<8x40xf32>
      %179 = vector.broadcast %177 : vector<1x40xf32> to vector<8x40xf32>
      %180 = arith.mulf %178, %179 : vector<8x40xf32>
      %181 = arith.addf %176, %180 : vector<8x40xf32>
      %182 = vector.broadcast %164 : vector<1x40xf32> to vector<8x40xf32>
      %183 = arith.addf %181, %182 : vector<8x40xf32>
      %184 = arith.mulf %183, %183 : vector<8x40xf32>
      %cst_73 = arith.constant 1.000000e+00 : f32
      %185 = vector.broadcast %cst_73 : f32 to vector<8x40xf32>
      %186 = arith.addf %185, %184 : vector<8x40xf32>
      %cst_74 = arith.constant 1.000000e+00 : f32
      %187 = vector.broadcast %cst_74 : f32 to vector<8x40xf32>
      %188 = arith.divf %187, %186 : vector<8x40xf32>
      %cst_75 = arith.constant dense<0.000000e+00> : vector<8x40xf32>
      %189 = tpu.matmul %188, %166, %cst_75 {dimension_numbers = #tpu.dot_dimension_numbers<[1], [0], [0], [1], [0, 0, 1, 1], [], []>} : vector<8x40xf32>, vector<40x40xf32>, vector<8x40xf32> -> vector<8x40xf32>
      %190 = vector.broadcast %168 : vector<1x40xf32> to vector<8x40xf32>
      %191 = arith.addf %189, %190 : vector<8x40xf32>
      %192 = arith.mulf %191, %191 : vector<8x40xf32>
      %cst_76 = arith.constant 1.000000e+00 : f32
      %193 = vector.broadcast %cst_76 : f32 to vector<8x40xf32>
      %194 = arith.addf %193, %192 : vector<8x40xf32>
      %cst_77 = arith.constant 1.000000e+00 : f32
      %195 = vector.broadcast %cst_77 : f32 to vector<8x40xf32>
      %196 = arith.divf %195, %194 : vector<8x40xf32>
      %197 = vector.broadcast %170 : vector<1x40xf32> to vector<8x40xf32>
      %198 = arith.mulf %196, %197 : vector<8x40xf32>
      %cst_78 = arith.constant dense<0.000000e+00> : vector<8xf32>
      %199 = vector.multi_reduction <add>, %198, %cst_78 [1] : vector<8x40xf32> to vector<8xf32>
      %200 = vector.shape_cast %199 : vector<8xf32> to vector<8x1xf32>
      %201 = vector.broadcast %172 : vector<1x1xf32> to vector<8x1xf32>
      %202 = arith.addf %200, %201 : vector<8x1xf32>
      %c8_i32_79 = arith.constant 8 : i32
      %203 = vector.broadcast %c8_i32_79 : i32 to vector<8x1xi32>
      %204 = arith.cmpi eq, %41, %203 : vector<8x1xi32>
      %205 = arith.select %204, %202, %150 : vector<8x1xi1>, vector<8x1xf32>
      %206 = tpu.transpose %205, [1, 0] : vector<8x1xf32> -> vector<1x8xf32>
      %c0_80 = arith.constant 0 : index
      %c0_81 = arith.constant 0 : index
      %c0_82 = arith.constant 0 : index
      %207 = vector.load %arg11[%c0_80, %c0_81, %c0_82] : memref<1x1x8xf32, #tpu.memory_space<vmem>>, vector<1x1x8xf32>
      %208 = vector.shape_cast %207 : vector<1x1x8xf32> to vector<1x8xf32>
      %209 = vector.shape_cast %206 : vector<1x8xf32> to vector<1x1x8xf32>
      tpu.vector_store %arg11[%c0_80, %c0_81, %c0_82], %209 {strides = array<i32>} : memref<1x1x8xf32, #tpu.memory_space<vmem>>, vector<1x1x8xf32>,
    } else {
    }
    return
  }
  func.func @transform_0(%arg0: i32) -> (i32, i32, i32) {
    %c0_i32 = arith.constant 0 : i32
    %c0_i32_0 = arith.constant 0 : i32
    %c0_i32_1 = arith.constant 0 : i32
    return %arg0, %c0_i32, %c0_i32_0 : i32, i32, i32
  }
  func.func @transform_1(%arg0: i32) -> (i32, i32) {
    %c0_i32 = arith.constant 0 : i32
    %c0_i32_0 = arith.constant 0 : i32
    %c0_i32_1 = arith.constant 0 : i32
    return %c0_i32, %c0_i32_0 : i32, i32
  }
  func.func @transform_2(%arg0: i32) -> (i32, i32) {
    %c0_i32 = arith.constant 0 : i32
    %c0_i32_0 = arith.constant 0 : i32
    %c0_i32_1 = arith.constant 0 : i32
    return %c0_i32, %c0_i32_0 : i32, i32
  }
  func.func @transform_3(%arg0: i32) -> (i32, i32) {
    %c0_i32 = arith.constant 0 : i32
    %c0_i32_0 = arith.constant 0 : i32
    %c0_i32_1 = arith.constant 0 : i32
    return %c0_i32, %c0_i32_0 : i32, i32
  }
  func.func @transform_4(%arg0: i32) -> (i32, i32, i32) {
    %c0_i32 = arith.constant 0 : i32
    %c0_i32_0 = arith.constant 0 : i32
    %c0_i32_1 = arith.constant 0 : i32
    %c0_i32_2 = arith.constant 0 : i32
    return %c0_i32, %c0_i32_0, %c0_i32_1 : i32, i32, i32
  }
  func.func @transform_5(%arg0: i32) -> (i32, i32, i32) {
    %c0_i32 = arith.constant 0 : i32
    %c0_i32_0 = arith.constant 0 : i32
    %c0_i32_1 = arith.constant 0 : i32
    %c0_i32_2 = arith.constant 0 : i32
    return %c0_i32, %c0_i32_0, %c0_i32_1 : i32, i32, i32
  }
  func.func @transform_6(%arg0: i32) -> (i32, i32, i32) {
    %c0_i32 = arith.constant 0 : i32
    %c0_i32_0 = arith.constant 0 : i32
    %c0_i32_1 = arith.constant 0 : i32
    %c0_i32_2 = arith.constant 0 : i32
    return %c0_i32, %c0_i32_0, %c0_i32_1 : i32, i32, i32
  }
  func.func @transform_7(%arg0: i32) -> (i32, i32, i32) {
    %c0_i32 = arith.constant 0 : i32
    %c0_i32_0 = arith.constant 0 : i32
    %c0_i32_1 = arith.constant 0 : i32
    %c0_i32_2 = arith.constant 0 : i32
    return %c0_i32, %c0_i32_0, %c0_i32_1 : i32, i32, i32
  }
  func.func @transform_8(%arg0: i32) -> (i32, i32, i32) {
    %c0_i32 = arith.constant 0 : i32
    %c0_i32_0 = arith.constant 0 : i32
    %c0_i32_1 = arith.constant 0 : i32
    %c0_i32_2 = arith.constant 0 : i32
    return %c0_i32, %c0_i32_0, %c0_i32_1 : i32, i32, i32
  }
  func.func @transform_9(%arg0: i32) -> (i32, i32, i32) {
    %c0_i32 = arith.constant 0 : i32
    %c0_i32_0 = arith.constant 0 : i32
    %c0_i32_1 = arith.constant 0 : i32
    %c0_i32_2 = arith.constant 0 : i32
    return %c0_i32, %c0_i32_0, %c0_i32_1 : i32, i32, i32
  }
  func.func @transform_10(%arg0: i32) -> (i32, i32, i32) {
    %c0_i32 = arith.constant 0 : i32
    %c0_i32_0 = arith.constant 0 : i32
    %c0_i32_1 = arith.constant 0 : i32
    return %arg0, %c0_i32, %c0_i32_0 : i32, i32, i32
  }
}

</mosaic_0001>

<bundles_post_ra>
// kernel: tpu_custom_call.1
= control target key start
LH: loop header
LB: loop body
LE: loop exit
PB: predicated region body
PF: predicated region fallthrough
CT: control target
= control target key end

     0   :  { %s2989_s0 = inlined_call_operand.vmem [shape: f32[2,3,8], index: 0, kind: input, shape index: {}]   ;;  %s2990_s1 = inlined_call_operand.vmem [shape: f32[3,16], index: 1, kind: input, shape index: {}]   ;;  %s2991_s2 = inlined_call_operand.vmem [shape: f32[16,16], index: 2, kind: input, shape index: {}]   ;;  %s2992_s3 = inlined_call_operand.hbm [shape: f32[16,16], index: 3, kind: input, shape index: {}]   ;;  %s2993_s4 = inlined_call_operand.vmem [shape: f32[2,2,40], index: 4, kind: input, shape index: {}]   ;;  %s2994_s5 = inlined_call_operand.vmem [shape: f32[2,1,40], index: 5, kind: input, shape index: {}]   ;;  %s2995_s6 = inlined_call_operand.hbm [shape: f32[2,40,40], index: 6, kind: input, shape index: {}]   ;;  %s2996_s7 = inlined_call_operand.vmem [shape: f32[2,1,40], index: 7, kind: input, shape index: {}]   ;;  %s2997_s8 = inlined_call_operand.vmem [shape: f32[2,1,40], index: 8, kind: input, shape index: {}]   ;;  %s2998_s9 = inlined_call_operand.vmem [shape: f32[2,1,1], index: 9, kind: input, shape index: {}]   ;;  %s2999_s10 = inlined_call_operand.hbm [shape: f32[2,1,8], index: 10, kind: output, shape index: {}]  }
   0x1   :  { %3001 = sst [smem:[#allocation11_spill]] %s2989_s0 }
   0x2   :  { %15 = vsyncpa [#allocation3], 0 }
   0x3   :  { %16 = vsyncpa [#allocation6], 0 }
   0x4   :  { %17 = vsyncpa [#allocation4], 0 }
   0x5   :  { %19 = vsyncpa [#allocation4 + $0x1], 0  ;;  %s2454_s13 = smov 0   ;;  %s2456_s14 = smov 0  }
   0x6   :  { %s2458_s15 = smov 0   ;;  %s2460_s16 = smov 0  }
   0x7 LB: > { %s2475_s17 = sadd.s32 4294967295, %s2379_s16   ;;  %s2023_s18 = sadd.s32 4294967294, %s2379_s16   ;;  %s2379_s16 = sphi %s2460_s16, %s3016_s16   ;;  %s2375_s15 = sphi %s2458_s15, %s3015_s15   ;;  %s2371_s14 = sphi %s2456_s14, %s3014_s14   ;;  %s2367_s13 = sphi %s2454_s13, %s3013_s13  }
   0x8   : > { %s2479_s19 = sadd.s32 1, %s2379_s16   ;;  %s247_s20 = sadd.s32 1, %s2375_s15 }
   0x9   : > { %s244_s21 = ssub.s32 %s2379_s16, %s2479_s19  ;;  %p257_p0 = scmp.ne.s32.totalorder %s2375_s15, %s2371_s14 }
   0xa   : > { %p245_p1 = scmp.eq.s32.totalorder %s244_s21, 0  ;;  %p258_p2 = scmp.eq.s32.totalorder %s2475_s17, 1 }
   0xb   : > { %p263_p3 = scmp.ne.s32.totalorder %s2371_s14, %s2367_s13  ;;  %p264_p4 = scmp.eq.s32.totalorder %s2023_s18, 1 }
   0xc   : > { %s2490_s22 = scalar_select %p245_p1, %s2375_s15, %s247_s20  }
   0xd   : > { %p2492_p5 = por %p258_p2, %p257_p0  ;;  %p2496_p6 = por %p264_p4, %p263_p3 }
   0xe   : > { %p2024_p7 = scmp.ge.s32.totalorder %s2379_s16, 1  ;;  %p271_p8 = scmp.lt.s32.totalorder %s2379_s16, 3 }
   0xf   : > { %s3003_s24 = scalar_select %p2496_p6, 1, 0 }
  0x10   : > { %p3000_p9 = scmp.eq.s32.totalorder %s2475_s17, 0  ;;  %p2503_p10 = pnand %p2024_p7, %p271_p8 }
  0x11   : > { %s2381_s26 = smov [#allocation2]   ;;  %s2382_s29 = smov [#allocation5]  }
  0x12   : > { %s289_s27 = sshll.u32 %s2381_s26, 4  ;;  %p2108_p11 = pneg %p2503_p10  ;;  %s290_s27 = int_to_ptr.vmem [resolvable:$true] %s289_s27 }
  0x13   : > { %s308_s30 = sshll.u32 %s2382_s29, 4  ;;  %s2270_s11 = scalar_lea.vmem %s290_s27, 256  ;;  %s309_s30 = int_to_ptr.vmem [resolvable:$true] %s308_s30 }
  0x14   : > { %p2511_p12 = pnand %p3000_p9, %p2108_p11  ;;  %p2271_p0 = scmp.ne.s32.totalorder %s290_s27, %s2270_s11 }
  0x15   : > { %p2278_p3 = scmp.lt.s32.totalorder %s290_s27, %s290_s27  ;;  %p2279_p4 = scmp.lt.s32.totalorder %s2270_s11, %s2270_s11 }
  0x16   : > { %p2261_p13 = pneg %p2511_p12 }
  0x17   : > { %p2280_p7 = por %p2279_p4, %p2278_p3 }
  0x18   : > { %p2273_p1 = pnand %p2271_p0, %p2261_p13 }
  0x1a   : > { %p2274_p2 = pneg %p2273_p1 }
  0x1c   : > { %p2281_p8 = pnand %p2280_p7, %p2274_p2 }
  0x1e   : > { %2284 = shalt.err (!%p2281_p8)
}
  0x1f   : > { %s2383_s12 = smov 128   ;;  %s2384_s18 = smov 8  }
  0x20   : > { %2111 = dma.hbm_to_vmem [thread:$0]  (!%p2511_p12), %s2992_s3, 256, %s290_s27, [#allocation3], %s2383_s12, %s2383_s12, %s2384_s18  }
  0x21   : > { %s2296_s26 = scalar_lea.vmem %s309_s30, 1280  ;;  %p2304_p9 = scmp.lt.s32.totalorder %s309_s30, %s309_s30 }
  0x22   : > { %p2297_p11 = scmp.ne.s32.totalorder %s309_s30, %s2296_s26  ;;  %p2305_p6 = scmp.lt.s32.totalorder %s2296_s26, %s2296_s26 }
  0x24   : > { %p2299_p0 = pnand %p2297_p11, %p2261_p13  ;;  %p2306_p3 = por %p2305_p6, %p2304_p9 }
  0x26   : > { %p2300_p1 = pneg %p2299_p0 }
  0x28   : > { %p2307_p2 = pnand %p2306_p3, %p2300_p1 }
  0x2a   : > { %2310 = shalt.err (!%p2307_p2)
}
  0x2b   : > { %2114 = dma.hbm_to_vmem [thread:$0]  (!%p2511_p12), %s2995_s6, 1280, %s309_s30, [#allocation6], %s2383_s12, %s2383_s12, %s2384_s18  }
  0x2c   : > { %340 = sbr.rel (%p2503_p10) target bundleno = 1905 (0x771), region = 60  ;;  %p3006_p4 = scmp.eq.s32.totalorder (!%p2503_p10), %s2475_s17, 0 }
  0x31   : > { %2354 = dma.done.wait (%p3006_p4), [#allocation3], 256   ;;  %p3007_p13 = pmov %p3006_p4 }
  0x32   : > { %p3008_p7 = pmov %p3006_p4 }
  0x33   : > { %2356 = vsyncadd (%p3007_p13), [#allocation3], 4294967040 }
  0x34   : > { %2358 = dma.done.wait (%p3008_p7), [#allocation6], 1280   ;;  %p3009_p6 = pmov %p3006_p4 }
  0x35   : > { %p380_p9 = scmp.lt.s32.totalorder %s2475_s17, 1  ;;  %s3010_s0 = sld [smem:[#allocation11_spill]]  ;;  %v2385_v3 = vmov 0   ;;  %v493_v7 = vlaneseq  ;;  %v385_v10 = vld [vmem:[%s2990_s1] sm:$0x7] }
  0x36   : > { %2360 = vsyncadd (%p3009_p6), [#allocation6], 4294966016  ;;  %s2549_s18 = sshll.u32 %s2475_s17, 3  ;;  %v2386_v63 = vmov 683565275   ;;  %s378_s30 = sand.u32 1, %s2371_s14  }
  0x37   : > { %s381_s27 = scalar_select %p380_p9, %s2475_s17, 1  ;;  %v2557_v8 = vshrl.u32 %v493_v7, 7  ;;  %v640_v30 = vstv %s2549_s18  ;;  %v2593_v34 = vand.u32 127, %v493_v7 }
  0x38   : > { %p1753_p10 = scmp.le.s32.totalorder %s2549_s18, 8  ;;  %s1754_s20 = sadd.s32 8, %s2549_s18 }
  0x39   : > { %s2031_s28 = sshll.u32 %s381_s27, 2  ;;  %p1755_p12 = scmp.gt.s32.totalorder %s1754_s20, 8  ;;  %v2560_v9 = vsub.s32 0, %v2557_v8  ;;  %v2566_v11 = vsub.s32 2, %v2557_v8  ;;  %v2569_v12 = vsub.s32 1, %v2557_v8  ;;  %v2588_v32 = vsub.s32 3, %v2557_v8 }
  0x3a   : > { %v2591_v33 = vadd.s32 %v640_v30, %v2557_v8  ;;  %v2598_v36 = vsub.s32 4, %v2557_v8  ;;  %v2608_v41 = vsub.s32 5, %v2557_v8  ;;  %v2624_v47 = vsub.s32 6, %v2557_v8 }
  0x3b   : > { %s383_s12 = scalar_lea.vmem %s3010_s0, %s2031_s28  ;;  %p2553_p8 = pnand %p1755_p12, %p1753_p10  ;;  %v496_v13 = vrot.slane %v385_v10, %v2560_v9  ;;  %v516_v15 = vrot.slane %v385_v10, %v2566_v11  ;;  %v506_v16 = vrot.slane %v385_v10, %v2569_v12  ;;  %v2631_v52 = vsub.s32 7, %v2557_v8 }
  0x3c   : > { %v386_v0 = vld [vmem:[%s383_s12] sm:$0x7]  ;;  %vm644_vm0 = vcmp.eq.s32.totalorder %v2591_v33, %v2593_v34  ;;  %v2389_v10 = vmov 2102212464   ;;  %s2925_s12 = scalar_lea.vmem [#allocation7], %s378_s30 }
  0x3d   : > { %387 = vxpose.xlu0.b32.start.end [1/1] (short) (narrow) %v386_v0, 8  ;;  %v454_v1 = vrot.slane %v386_v0, 2  ;;  %v420_v2 = vrot.slane %v386_v0, 1 }
  0x3f   : > { %456 = vxpose.xlu1.b32.start.end [1/1] (short) (narrow) %v454_v1, 8  ;;  %v2387_v1 = vmov 2475754826  }
  0x41   : > { %422 = vxpose.xlu0.b32.start.end [1/1] (short) (narrow) %v420_v2, 8 }
  0x5d   : > { %2173 = vset.pattern.permute.xlu1 %v2385_v3 }
  0x6a   : > { %2174 = vset.pattern.permute.xlu0 %v2385_v3 }
  0xb9   : > { %v403_v4 = vpop.trf.xlu0 }
  0xba   : > { %490 = vperm.xlu1 %2173, %v403_v4  }
  0xbb   : > { %v472_v5 = vpop.trf.xlu1 }
  0xbd   : > { %v438_v6 = vpop.trf.xlu0 }
  0xbe   : > { %510 = vperm.xlu1 %2173, %v472_v5   ;;  %500 = vperm.xlu0 %2174, %v438_v6   ;;  %v2388_v5 = vmov 2131351028  }
 0x135   : > { %v491_v14 = vpop.permute.xlu1 %490 }
 0x136   : > { %v497_v17 = vsub.f32 %v491_v14, %v496_v13 }
 0x138   : > { %v518_v22 = vmul.f32 %v497_v17, %v497_v17 }
 0x139   : > { %v511_v18 = vpop.permute.xlu1 %510  ;;  %v501_v19 = vpop.permute.xlu0 %500 }
 0x13a   : > { %v517_v20 = vsub.f32 %v511_v18, %v516_v15  ;;  %v507_v21 = vsub.f32 %v501_v19, %v506_v16  ;;  %v2390_v15 = vmov 920167782   ;;  %v2391_v18 = vmov 1326507024  }
 0x13c   : > { %v519_v23 = vmul.f32 %v507_v21, %v507_v21  ;;  %v521_v24 = vmul.f32 %v517_v20, %v517_v20 }
 0x13e   : > { %v520_v25 = vadd.f32 %v519_v23, %v518_v22 }
 0x140   : > { %v2574_v26 = vadd.f32 %v521_v24, %v520_v25 }
 0x142   : > { %2175 = vrsqrt.f32 %v2574_v26  ;;  %v2578_v27 = vmul.f32 0.4, %v2574_v26  ;;  %vm525_vm1 = vcmp.eq.f32.partialorder %v2574_v26, inf  ;;  %v528_v39 = vand.u32 2147483648, %v2574_v26 }
 0x143   : > { %vm527_vm2 = vcmp.eq.f32.partialorder %v2574_v26, 0.0 }
 0x144   : > { %v686_v28 = vrot.slane %v2578_v27, %v2569_v12  ;;  %v675_v29 = vrot.slane %v2578_v27, %v2560_v9  ;;  %v697_v31 = vrot.slane %v2578_v27, %v2566_v11  ;;  %v708_v35 = vrot.slane %v2578_v27, %v2588_v32 }
 0x145   : > { %v719_v40 = vrot.slane %v2578_v27, %v2598_v36  ;;  %v730_v46 = vrot.slane %v2578_v27, %v2608_v41  ;;  %v741_v51 = vrot.slane %v2578_v27, %v2624_v47  ;;  %v752_v56 = vrot.slane %v2578_v27, %v2631_v52 }
 0x146   : > { %692 = vbcast.lane.b32.xlu0 %v686_v28, 264  ;;  %677 = vbcast.lane.b32.xlu1 %v675_v29, 256 }
 0x14a   : > { %703 = vbcast.lane.b32.xlu0 %v697_v31, 264  ;;  %681 = vbcast.lane.b32.xlu1 %v675_v29, 264 }
 0x14e   : > { %714 = vbcast.lane.b32.xlu0 %v708_v35, 264  ;;  %688 = vbcast.lane.b32.xlu1 %v686_v28, 256 }
 0x14f   : > { %v2176_v37 = vpop.eup %2175 }
 0x150   : > { %v524_v38 = vmul.f32 %v2176_v37, %v2574_v26 }
 0x152   : > { %v526_v42 = vsel %vm525_vm1, %v2574_v26, %v524_v38  ;;  %725 = vbcast.lane.b32.xlu0 %v719_v40, 264  ;;  %699 = vbcast.lane.b32.xlu1 %v697_v31, 256 }
 0x153   : > { %v2612_v43 = vsel %vm527_vm2, %v528_v39, %v526_v42  ;;  %vm1503_vm2 = vcmask 130112  }
 0x154   : > { %v2615_v44 = vmul.f32 1.0471976, %v2612_v43  ;;  %v662_v45 = vsel %vm644_vm0, 1.0, %v2612_v43  ;;  %vm530_vm1 = vcmp.le.f32.partialorder %v2612_v43, 3.0 }
 0x155   : > { %2177 = vrcp.f32 %v662_v45 }
 0x156   : > { %v535_v48 = vand.u32 2139095040, %v2615_v44  ;;  %v532_v49 = vand.u32 2147483647, %v2615_v44  ;;  %736 = vbcast.lane.b32.xlu0 %v730_v46, 264  ;;  %710 = vbcast.lane.b32.xlu1 %v708_v35, 256  ;;  %vm534_vm10 = vcmp.lt.s32.totalorder %v2615_v44, 0  ;;  %vm624_vm15 = vweird.f32 %v2615_v44 }
 0x158   : > { %v536_v50 = vshrl.u32 %v535_v48, 23  ;;  %v539_v54 = vand.u32 8388607, %v532_v49  ;;  %vm533_vm11 = vcmp.le.f32.partialorder %v532_v49, 0.7853982 }
 0x15a   : > { %v2033_v53 = vadd.s32 4294967169, %v536_v50  ;;  %747 = vbcast.lane.b32.xlu0 %v741_v51, 264  ;;  %721 = vbcast.lane.b32.xlu1 %v719_v40, 256  ;;  %v540_v57 = vor.u32 8388608, %v539_v54 }
 0x15c   : > { %v542_v55 = vadd.s32 1, %v2033_v53  ;;  %v580_v3 = vshll.u32 %v540_v57, 8 }
 0x15e   : > { %vm543_vm3 = vcmp.gt.s32.totalorder %v542_v55, 0  ;;  %758 = vbcast.lane.b32.xlu0 %v752_v56, 264  ;;  %732 = vbcast.lane.b32.xlu1 %v730_v46, 256 }
 0x15f   : > { %v544_v58 = vsel %vm543_vm3, %v542_v55, 0  ;;  %vm1568_vm3 = vcmask 1041409  }
 0x160   : > { %v546_v59 = vand.u32 31, %v544_v58  ;;  %v545_v62 = vshrl.u32 %v544_v58, 5 }
 0x162   : > { %v547_v60 = vsub.s32 32, %v546_v59  ;;  %v2178_v61 = vpop.eup %2177  ;;  %v549_v0 = vshll.u32 %v2386_v63, %v546_v59  ;;  %v552_v2 = vshll.u32 %v2387_v1, %v546_v59  ;;  %743 = vbcast.lane.b32.xlu1 %v741_v51, 256  ;;  %v555_v7 = vshll.u32 %v2388_v5, %v546_v59 }
 0x163   : > { %v558_v14 = vshll.u32 %v2389_v10, %v546_v59  ;;  %v561_v17 = vshll.u32 %v2390_v15, %v546_v59  ;;  %v664_v23 = vmul.f32 %v2178_v61, %v662_v45  ;;  %vm564_vm4 = vcmp.lt.s32.totalorder %v545_v62, 1 }
 0x164   : > { %v550_v4 = vshrl.u32 %v2387_v1, %v547_v60  ;;  %v553_v6 = vshrl.u32 %v2388_v5, %v547_v60  ;;  %v556_v13 = vshrl.u32 %v2389_v10, %v547_v60  ;;  %v559_v16 = vshrl.u32 %v2390_v15, %v547_v60 }
 0x165   : > { %v562_v19 = vshrl.u32 %v2391_v18, %v547_v60  ;;  %vm567_vm5 = vcmp.lt.s32.totalorder %v545_v62, 4  ;;  %v548_v28 = vshrl.u32 %v2386_v63, %v547_v60  ;;  %vm566_vm6 = vcmp.lt.s32.totalorder %v545_v62, 3 }
 0x166   : > { %v551_v20 = vor.u32 %v550_v4, %v549_v0  ;;  %v554_v21 = vor.u32 %v553_v6, %v552_v2  ;;  %v557_v22 = vor.u32 %v556_v13, %v555_v7  ;;  %v560_v24 = vor.u32 %v559_v16, %v558_v14  ;;  %754 = vbcast.lane.b32.xlu1 %v752_v56, 256 }
 0x167   : > { %v563_v25 = vor.u32 %v562_v19, %v561_v17  ;;  %v665_v38 = vsub.f32 2.0, %v664_v23  ;;  %vm565_vm7 = vcmp.lt.s32.totalorder %v545_v62, 2 }
 0x168   : > { %v569_v29 = vsel %vm567_vm5, %v557_v22, 2102212464  ;;  %v572_v30 = vsel %vm564_vm4, %v551_v20, %v554_v21  ;;  %v576_v31 = vsel %vm564_vm4, %v554_v21, %v557_v22  ;;  %v573_v35 = vsel %vm567_vm5, %v560_v24, 920167782 }
 0x169   : > { %v577_v37 = vsel %vm567_vm5, %v563_v25, 1326507024  ;;  %v568_v39 = vsel %vm564_vm4, %v548_v28, %v551_v20  ;;  %v574_v40 = vsel %vm566_vm6, %v557_v22, %v573_v35  ;;  %v570_v46 = vsel %vm566_vm6, %v554_v21, %v569_v29 }
 0x16a   : > { %v578_v42 = vsel %vm566_vm6, %v560_v24, %v577_v37  ;;  %v575_v48 = vsel %vm565_vm7, %v572_v30, %v574_v40  ;;  %v2637_v50 = vmul.f32 %v2178_v61, %v665_v38  ;;  %v571_v57 = vsel %vm565_vm7, %v568_v39, %v570_v46 }
 0x16b   : > { %v579_v45 = vsel %vm565_vm7, %v576_v31, %v578_v42  ;;  %v2642_v54 = vmul.u32.u64.low %v580_v3, %v575_v48  ;;  %v2643_v55 = vmul.u32.u64.high %v580_v3, %v575_v48, %v2642_v54  ;;  %v587_v59 = vmul.u32 %v580_v3, %v571_v57 }
 0x16c   : > { %v2639_v51 = vmul.u32.u64.low %v580_v3, %v579_v45  ;;  %v2640_v53 = vmul.u32.u64.high %v580_v3, %v579_v45, %v2639_v51  ;;  %v885_v56 = vrot.slane %v2637_v50, %v2560_v9  ;;  %v896_v60 = vrot.slane %v2637_v50, %v2569_v12 }
 0x16d   : > { %v590_v58 = vadd.s32 1, %v2643_v55  ;;  %v907_v0 = vrot.slane %v2637_v50, %v2566_v11  ;;  %v918_v4 = vrot.slane %v2637_v50, %v2588_v32  ;;  %v929_v6 = vrot.slane %v2637_v50, %v2598_v36 }
 0x16e   : > { %891 = vbcast.lane.b32.xlu0 %v885_v56, 264  ;;  %887 = vbcast.lane.b32.xlu1 %v885_v56, 256  ;;  %vm589_vm8 = vc.u32 %v2640_v53, %v2642_v54  ;;  %v940_v13 = vrot.slane %v2637_v50, %v2608_v41  ;;  %v951_v15 = vrot.slane %v2637_v50, %v2624_v47  ;;  %v2037_v35 = vadd.f32 -0.5, %v2612_v43 }
 0x16f   : > { %v591_v61 = vsel %vm589_vm8, %v590_v58, %v2643_v55  ;;  %v588_v17 = vadd.s32 %v2642_v54, %v2640_v53  ;;  %v962_v23 = vrot.slane %v2637_v50, %v2631_v52  ;;  %v657_v46 = vmul.f32 -0.5, %v2574_v26 }
 0x170   : > { %v592_v62 = vadd.s32 %v591_v61, %v587_v59  ;;  %v647_v40 = vmul.f32 %v2037_v35, %v2037_v35  ;;  %vm1570_vm4 = vcmask 1042434   ;;  %vm1572_vm5 = vcmask 1043459  }
 0x171   : > { %v658_v51 = vmul.f32 1.442695, %v657_v46  ;;  %vm1574_vm6 = vcmask 1044484   ;;  %vm1576_vm7 = vcmask 1045509   ;;  %vm1578_vm8 = vcmask 1046534  }
 0x172   : > { %902 = vbcast.lane.b32.xlu0 %v896_v60, 264  ;;  %898 = vbcast.lane.b32.xlu1 %v896_v60, 256  ;;  %v593_v63 = vadd.s32 536870912, %v592_v62  ;;  %v648_v48 = vmul.f32 -0.5, %v647_v40 }
 0x174   : > { %v594_v1 = vshrl.u32 %v593_v63, 30  ;;  %v649_v53 = vmul.f32 1.442695, %v648_v48 }
 0x176   : > { %913 = vbcast.lane.b32.xlu0 %v907_v0, 264  ;;  %909 = vbcast.lane.b32.xlu1 %v907_v0, 256  ;;  %v595_v2 = vshll.u32 %v594_v1, 30  ;;  %v618_v42 = vsub.s32 4, %v594_v1 }
 0x178   : > { %v596_v3 = vsub.s32 %v592_v62, %v595_v2  ;;  %v619_v45 = vsel %vm534_vm10, %v618_v42, %v594_v1  ;;  %v2392_v2 = vmov 1.0  }
 0x179   : > { %v621_v54 = vsel %vm533_vm11, 0, %v619_v45 }
 0x17a   : > { %924 = vbcast.lane.b32.xlu0 %v918_v4, 264  ;;  %920 = vbcast.lane.b32.xlu1 %v918_v4, 256  ;;  %v598_v5 = vsub.s32 0, %v596_v3  ;;  %v625_v55 = vand.u32 3, %v621_v54  ;;  %v645_v4 = vsel %vm644_vm0, 0.0, %v2392_v2  ;;  %vm653_vm0 = vcmask 130048  }
 0x17c   : > { %v2034_v7 = vmin.u32 %v598_v5, %v596_v3  ;;  %vm630_vm12 = vcmp.eq.s32.totalorder %v625_v55, 2  ;;  %vm627_vm13 = vcmp.eq.s32.totalorder %v625_v55, 0  ;;  %vm626_vm14 = vcmp.lt.s32.totalorder %v625_v55, 2 }
 0x17e   : > { %935 = vbcast.lane.b32.xlu0 %v929_v6, 264  ;;  %931 = vbcast.lane.b32.xlu1 %v929_v6, 256  ;;  %v600_v10 = vclz %v2034_v7 }
 0x180   : > { %v2035_v14 = vadd.s32 4294967294, %v600_v10 }
 0x182   : > { %946 = vbcast.lane.b32.xlu0 %v940_v13, 264  ;;  %942 = vbcast.lane.b32.xlu1 %v940_v13, 256  ;;  %vm2036_vm9 = vcmp.lt.s32.totalorder %v2035_v14, 0 }
 0x183   : > { %v603_v16 = vsel %vm2036_vm9, 0, %v2035_v14  ;;  %vm1580_vm9 = vcmask 1047559  }
 0x184   : > { %v604_v18 = vsub.s32 32, %v603_v16  ;;  %v608_v19 = vsub.s32 4294967266, %v603_v16  ;;  %v605_v20 = vshll.u32 %v596_v3, %v603_v16 }
 0x186   : > { %957 = vbcast.lane.b32.xlu0 %v951_v15, 264  ;;  %953 = vbcast.lane.b32.xlu1 %v951_v15, 256  ;;  %v606_v21 = vshrl.u32 %v588_v17, %v604_v18  ;;  %v609_v22 = vadd.s32 127, %v608_v19 }
 0x188   : > { %v607_v24 = vor.u32 %v606_v21, %v605_v20  ;;  %v610_v25 = vshll.u32 %v609_v22, 23 }
 0x18a   : > { %968 = vbcast.lane.b32.xlu0 %v962_v23, 264  ;;  %964 = vbcast.lane.b32.xlu1 %v962_v23, 256  ;;  %v611_v28 = vor.u32 4788187, %v610_v25  ;;  %v614_v30 = vcvt.s32.f32 %v607_v24 }
 0x18c   : > { %v612_v29 = vand.u32 2147483647, %v611_v28 }
 0x18e   : > { %v615_v31 = vmul.f32 %v614_v30, %v612_v29 }
 0x190   : > { %v616_v37 = vxor.u32 2147483648, %v615_v31 }
 0x192   : > { %v617_v38 = vsel %vm534_vm10, %v616_v37, %v615_v31  ;;  %vm2395_vm10 = vmmov 0  }
 0x193   : > { %v620_v39 = vsel %vm533_vm11, %v2615_v44, %v617_v38  ;;  %vm1624_vm11 = vcmask 326656  }
 0x194   : > { %2179 = vcosq.f32 %v620_v39 }
 0x195   : > { %2181 = vsinq.f32 %v620_v39 }
 0x196   : > { %2183 = vpow2.f32 %v658_v51  ;;  %v2739_v51 = vld [vmem:[%s2991_s2 + $0x8] sm:$0xff] }
 0x197   : > { %2185 = vpow2.f32 %v649_v53 }
 0x1a1   : > { %v2180_v56 = vpop.eup %2179 }
 0x1a2   : > { %v2182_v57 = vpop.eup %2181  ;;  %v631_v49 = vxor.u32 2147483648, %v2180_v56 }
 0x1a3   : > { %v628_v58 = vxor.u32 2147483648, %v2182_v57  ;;  %v2184_v0 = vpop.eup %2183 }
 0x1a4   : > { %v632_v59 = vsel %vm630_vm12, %v631_v49, %v2182_v57  ;;  %v2186_v1 = vpop.eup %2185  ;;  %vm1751_vm12 = vcmask 57344  }
 0x1a5   : > { %v629_v60 = vsel %vm627_vm13, %v2180_v56, %v628_v58 }
 0x1a6   : > { %v633_v26 = vsel %vm626_vm14, %v629_v60, %v632_v59 }
 0x1a7   : > { %v634_v61 = vsel %vm624_vm15, nan, %v633_v26  ;;  %v777_v26 = vcombine.high %v2578_v27, %v2578_v27 }
 0x1a8   : > { %v635_v62 = vadd.f32 1.0, %v634_v61 }
 0x1aa   : > { %v636_v63 = vmul.f32 0.5, %v635_v62 }
 0x1ac   : > { %v637_v3 = vsel %vm530_vm1, %v636_v63, 0.0 }
 0x1ad   : > { %v660_v5 = vmul.f32 %v2184_v0, %v637_v3  ;;  %v651_v6 = vmul.f32 %v2186_v1, %v637_v3 }
 0x1af   : > { %v2676_v7 = vmul.f32 %v660_v5, %v645_v4  ;;  %v2678_v10 = vmul.f32 %v651_v6, %v645_v4  ;;  %v971_v5 = vcombine.high %v2637_v50, %v2637_v50 }
 0x1b1   : > { %v1207_v44 = vrot.slane %v2676_v7, %v2560_v9  ;;  %v1218_v43 = vrot.slane %v2676_v7, %v2569_v12  ;;  %v1229_v15 = vrot.slane %v2676_v7, %v2566_v11  ;;  %v1240_v18 = vrot.slane %v2676_v7, %v2588_v32 }
 0x1b2   : > { %v1251_v20 = vrot.slane %v2676_v7, %v2598_v36  ;;  %v1262_v11 = vrot.slane %v2676_v7, %v2608_v41  ;;  %v2393_v32 = vmov 1966171168   ;;  %v1273_v36 = vrot.slane %v2676_v7, %v2624_v47 }
 0x1b3   : > { %1213 = vbcast.lane.b32.xlu0 %v1207_v44, 264  ;;  %1209 = vbcast.lane.b32.xlu1 %v1207_v44, 256  ;;  %v779_v24 = vunpack.c.l.s4 %v2393_v32  ;;  %v1284_v30 = vrot.slane %v2676_v7, %v2631_v52  ;;  %v2730_v52 = vld [vmem:[%s2991_s2] sm:$0xff] }
 0x1b5   : > { %v780_v29 = vunpack.c.0.s8 %v779_v24 }
 0x1b7   : > { %1224 = vbcast.lane.b32.xlu0 %v1218_v43, 264  ;;  %1220 = vbcast.lane.b32.xlu1 %v1218_v43, 256  ;;  %v2717_v35 = vsub.s32 %v780_v29, %v2557_v8 }
 0x1b8   : > { %v2684_v13 = vpop.permute.xlu0 %692  ;;  %v678_v14 = vpop.permute.xlu1 %677 }
 0x1b9   : > { %v784_v47 = vrot.slane %v2578_v27, %v2717_v35  ;;  %v978_v39 = vrot.slane %v2637_v50, %v2717_v35  ;;  %v760_v53 = vsub.f32 %v2730_v52, %v678_v14  ;;  %v763_v59 = vsub.f32 %v2739_v51, %v2684_v13 }
 0x1ba   : > { %v791_v14 = vrot.slane %v777_v26, %v2717_v35 }
 0x1bb   : > { %1235 = vbcast.lane.b32.xlu0 %v1229_v15, 264  ;;  %1231 = vbcast.lane.b32.xlu1 %v1229_v15, 256  ;;  %v792_v40 = vcombine.high %v784_v47, %v784_v47  ;;  %v800_v42 = vrot.slane %v784_v47, %v2717_v35  ;;  %v994_v48 = vrot.slane %v978_v39, %v2717_v35 }
 0x1bc   : > { %v682_v16 = vpop.permute.xlu1 %681  ;;  %v2688_v17 = vpop.permute.xlu0 %703  ;;  %v986_v45 = vcombine.high %v978_v39, %v978_v39 }
 0x1bd   : > { %v761_v55 = vsub.f32 %v2739_v51, %v682_v16  ;;  %v814_v56 = vrot.slane %v792_v40, %v2717_v35  ;;  %v829_v57 = vrot.slane %v800_v42, %v2560_v9  ;;  %v1023_v49 = vrot.slane %v994_v48, %v2560_v9 }
 0x1be   : > { %v1008_v58 = vrot.slane %v986_v45, %v2717_v35  ;;  %v822_v3 = vcombine.high %v800_v42, %v800_v42  ;;  %v1016_v43 = vcombine.high %v994_v48, %v994_v48  ;;  %v807_v45 = vrot.slane %v791_v14, %v2717_v35 }
 0x1bf   : > { %1246 = vbcast.lane.b32.xlu0 %v1240_v18, 264  ;;  %1242 = vbcast.lane.b32.xlu1 %v1240_v18, 256  ;;  %v866_v60 = vsub.f32 %v760_v53, %v829_v57  ;;  %v867_v63 = vsub.f32 %v761_v55, %v829_v57  ;;  %v833_v4 = vrot.slane %v814_v56, %v2560_v9 }
 0x1c0   : > { %v2692_v19 = vpop.permute.xlu1 %688  ;;  %v2696_v21 = vpop.permute.xlu0 %714  ;;  %v1027_v27 = vrot.slane %v1008_v58, %v2560_v9  ;;  %v765_v18 = vsub.f32 %v2739_v51, %v2688_v17  ;;  %v837_v50 = vrot.slane %v822_v3, %v2560_v9  ;;  %v824_v32 = vcombine.high %v814_v56, %v814_v56 }
 0x1c1   : > { %v762_v0 = vsub.f32 %v2730_v52, %v2692_v19  ;;  %v869_v13 = vsub.f32 %v763_v59, %v833_v4  ;;  %v1031_v47 = vrot.slane %v1016_v43, %v2560_v9  ;;  %v1018_v39 = vcombine.high %v1008_v58, %v1008_v58 }
 0x1c2   : > { %v767_v17 = vsub.f32 %v2739_v51, %v2696_v21  ;;  %v871_v48 = vsub.f32 %v765_v18, %v837_v50  ;;  %v841_v55 = vrot.slane %v824_v32, %v2560_v9  ;;  %v793_v57 = vcombine.high %v791_v14, %v791_v14 }
 0x1c3   : > { %1257 = vbcast.lane.b32.xlu0 %v1251_v20, 264  ;;  %1253 = vbcast.lane.b32.xlu1 %v1251_v20, 256  ;;  %v868_v19 = vsub.f32 %v762_v0, %v833_v4  ;;  %v1035_v58 = vrot.slane %v1018_v39, %v2560_v9  ;;  %v845_v4 = vrot.slane %v807_v45, %v2560_v9 }
 0x1c4   : > { %v2698_v22 = vpop.permute.xlu1 %699  ;;  %v2704_v25 = vpop.permute.xlu0 %725  ;;  %v873_v26 = vsub.f32 %v767_v17, %v841_v55  ;;  %v821_v3 = vrot.slane %v793_v57, %v2717_v35 }
 0x1c5   : > { %v764_v24 = vsub.f32 %v2730_v52, %v2698_v22 }
 0x1c7   : > { %1268 = vbcast.lane.b32.xlu0 %v1262_v11, 264  ;;  %1264 = vbcast.lane.b32.xlu1 %v1262_v11, 256  ;;  %v870_v56 = vsub.f32 %v764_v24, %v837_v50  ;;  %v849_v50 = vrot.slane %v821_v3, %v2560_v9 }
 0x1c8   : > { %v2702_v23 = vpop.permute.xlu1 %710  ;;  %v2712_v41 = vpop.permute.xlu0 %736 }
 0x1c9   : > { %v766_v22 = vsub.f32 %v2730_v52, %v2702_v23  ;;  %v769_v23 = vsub.f32 %v2739_v51, %v2704_v25  ;;  %v771_v18 = vsub.f32 %v2739_v51, %v2712_v41 }
 0x1cb   : > { %1279 = vbcast.lane.b32.xlu0 %v1273_v36, 264  ;;  %1275 = vbcast.lane.b32.xlu1 %v1273_v36, 256  ;;  %v985_v36 = vrot.slane %v971_v5, %v2717_v35  ;;  %v872_v0 = vsub.f32 %v766_v22, %v841_v55 }
 0x1cc   : > { %v2708_v28 = vpop.permute.xlu1 %721  ;;  %v2723_v38 = vpop.permute.xlu0 %747 }
 0x1cd   : > { %v1001_v21 = vrot.slane %v985_v36, %v2717_v35  ;;  %v768_v5 = vsub.f32 %v2730_v52, %v2708_v28 }
 0x1cf   : > { %1290 = vbcast.lane.b32.xlu0 %v1284_v30, 264  ;;  %1286 = vbcast.lane.b32.xlu1 %v1284_v30, 256 }
 0x1d0   : > { %v2714_v31 = vpop.permute.xlu1 %732  ;;  %v2742_v54 = vpop.permute.xlu0 %758 }
 0x1d4   : > { %v2719_v37 = vpop.permute.xlu1 %743 }
 0x1d8   : > { %v2733_v46 = vpop.permute.xlu1 %754 }
 0x1e0   : > { %v892_v61 = vpop.permute.xlu0 %891  ;;  %v888_v62 = vpop.permute.xlu1 %887 }
 0x1e1   : > { %v1061_v1 = vmul.f32 %v1023_v49, %v892_v61  ;;  %v1060_v2 = vmul.f32 %v1023_v49, %v888_v62 }
 0x1e3   : > { %v2758_v6 = vmul.f32 %v1061_v1, %v867_v63  ;;  %v2760_v44 = vmul.f32 %v1060_v2, %v866_v60  ;;  %v987_v60 = vcombine.high %v985_v36, %v985_v36  ;;  %v823_v36 = vcombine.high %v807_v45, %v807_v45 }
 0x1e4   : > { %v903_v15 = vpop.permute.xlu0 %902  ;;  %v899_v16 = vpop.permute.xlu1 %898 }
 0x1e5   : > { %v1063_v20 = vmul.f32 %v1027_v27, %v903_v15  ;;  %v1062_v11 = vmul.f32 %v1027_v27, %v899_v16  ;;  %v1015_v14 = vrot.slane %v987_v60, %v2717_v35  ;;  %v875_v16 = vsub.f32 %v769_v23, %v845_v4 }
 0x1e6   : > { %v1093_v45 = vadd.f32 1.0, %v2758_v6 }
 0x1e7   : > { %v2770_v29 = vmul.f32 %v1063_v20, %v869_v13  ;;  %v2772_v30 = vmul.f32 %v1062_v11, %v868_v19  ;;  %v1039_v13 = vrot.slane %v1001_v21, %v2560_v9  ;;  %v770_v19 = vsub.f32 %v2730_v52, %v2714_v31 }
 0x1e8   : > { %v914_v40 = vpop.permute.xlu0 %913  ;;  %v910_v42 = vpop.permute.xlu1 %909  ;;  %v874_v11 = vsub.f32 %v768_v5, %v845_v4  ;;  %v1043_v24 = vrot.slane %v1015_v14, %v2560_v9  ;;  %v773_v31 = vsub.f32 %v2739_v51, %v2723_v38  ;;  %v1019_v57 = vcombine.high %v1015_v14, %v1015_v14 }
 0x1e9   : > { %v1065_v53 = vmul.f32 %v1031_v47, %v914_v40  ;;  %v1064_v49 = vmul.f32 %v1031_v47, %v910_v42  ;;  %v1017_v40 = vcombine.high %v1001_v21, %v1001_v21  ;;  %v877_v42 = vsub.f32 %v771_v18, %v849_v50 }
 0x1ea   : > { %v1109_v6 = vmax.f32 %v1093_v45, 1e-12  ;;  %v1095_v14 = vadd.f32 1.0, %v2770_v29 }
 0x1eb   : > { %v2781_v59 = vmul.f32 %v1065_v53, %v871_v48  ;;  %v2785_v61 = vmul.f32 %v1064_v49, %v870_v56  ;;  %v876_v48 = vsub.f32 %v770_v19, %v849_v50  ;;  %v772_v53 = vsub.f32 %v2730_v52, %v2719_v37 }
 0x1ec   : > { %v925_v62 = vpop.permute.xlu0 %924  ;;  %v921_v63 = vpop.permute.xlu1 %920  ;;  %v853_v49 = vrot.slane %v823_v36, %v2560_v9  ;;  %v775_v37 = vsub.f32 %v2739_v51, %v2742_v54  ;;  %2187 = vlog2.f32 %v1109_v6  ;;  %v1111_v19 = vmax.f32 %v1095_v14, 1e-12 }
 0x1ed   : > { %v1067_v1 = vmul.f32 %v1035_v58, %v925_v62  ;;  %v1066_v2 = vmul.f32 %v1035_v58, %v921_v63  ;;  %v1047_v58 = vrot.slane %v1017_v40, %v2560_v9  ;;  %v1092_v63 = vadd.f32 1.0, %v2760_v44 }
 0x1ee   : > { %v879_v62 = vsub.f32 %v773_v31, %v853_v49 }
 0x1ef   : > { %v2793_v27 = vmul.f32 %v1067_v1, %v873_v26  ;;  %v2795_v43 = vmul.f32 %v1066_v2, %v872_v0  ;;  %v825_v26 = vcombine.high %v821_v3, %v821_v3  ;;  %v878_v0 = vsub.f32 %v772_v53, %v853_v49 }
 0x1f0   : > { %v936_v15 = vpop.permute.xlu0 %935  ;;  %v932_v25 = vpop.permute.xlu1 %931  ;;  %v1051_v1 = vrot.slane %v1019_v57, %v2560_v9  ;;  %v774_v2 = vsub.f32 %v2730_v52, %v2733_v46  ;;  %v1097_v52 = vadd.f32 1.0, %v2781_v59 }
 0x1f1   : > { %v1069_v20 = vmul.f32 %v1039_v13, %v936_v15  ;;  %v1068_v28 = vmul.f32 %v1039_v13, %v932_v25  ;;  %v857_v3 = vrot.slane %v825_v26, %v2560_v9  ;;  %v1108_v25 = vmax.f32 %v1092_v63, 1e-12 }
 0x1f2   : > { %v1113_v29 = vmax.f32 %v1097_v52, 1e-12  ;;  %v1099_v50 = vadd.f32 1.0, %v2793_v27 }
 0x1f3   : > { %v1085_v32 = vmul.f32 %v1069_v20, %v875_v16  ;;  %v1084_v47 = vmul.f32 %v1068_v28, %v874_v11  ;;  %v1094_v16 = vadd.f32 1.0, %v2772_v30  ;;  %v881_v54 = vsub.f32 %v775_v37, %v857_v3 }
 0x1f4   : > { %v947_v39 = vpop.permute.xlu0 %946  ;;  %v943_v17 = vpop.permute.xlu1 %942  ;;  %v880_v18 = vsub.f32 %v774_v2, %v857_v3  ;;  %2189 = vlog2.f32 %v1108_v25  ;;  %v1096_v11 = vadd.f32 1.0, %v2785_v61  ;;  %v1098_v30 = vadd.f32 1.0, %v2795_v43 }
 0x1f5   : > { %v1071_v22 = vmul.f32 %v1043_v24, %v947_v39  ;;  %v1070_v41 = vmul.f32 %v1043_v24, %v943_v17  ;;  %v1110_v20 = vmax.f32 %v1094_v16, 1e-12  ;;  %2191 = vlog2.f32 %v1111_v19 }
 0x1f6   : > { %v1112_v24 = vmax.f32 %v1096_v11, 1e-12  ;;  %v1101_v36 = vadd.f32 1.0, %v1085_v32  ;;  %v1115_v39 = vmax.f32 %v1099_v50, 1e-12  ;;  %v1100_v17 = vadd.f32 1.0, %v1084_v47 }
 0x1f7   : > { %v1087_v55 = vmul.f32 %v1071_v22, %v877_v42  ;;  %v1086_v56 = vmul.f32 %v1070_v41, %v876_v48  ;;  %2193 = vlog2.f32 %v1110_v20  ;;  %v1114_v59 = vmax.f32 %v1098_v30, 1e-12 }
 0x1f8   : > { %v958_v21 = vpop.permute.xlu0 %957  ;;  %v954_v60 = vpop.permute.xlu1 %953  ;;  %2195 = vlog2.f32 %v1113_v29  ;;  %v1117_v40 = vmax.f32 %v1101_v36, 1e-12  ;;  %v1116_v61 = vmax.f32 %v1100_v17, 1e-12 }
 0x1f9   : > { %v1073_v23 = vmul.f32 %v1047_v58, %v958_v21  ;;  %v1072_v38 = vmul.f32 %v1047_v58, %v954_v60  ;;  %2197 = vlog2.f32 %v1112_v24  ;;  %v1103_v42 = vadd.f32 1.0, %v1087_v55  ;;  %v2188_v48 = vpop.eup %2187 }
 0x1fa   : > { %2199 = vlog2.f32 %v1115_v39  ;;  %v1102_v22 = vadd.f32 1.0, %v1086_v56  ;;  %v1127_v53 = vmul.f32 0.6931472, %v2188_v48  ;;  %v2832_v48 = vld [vmem:[#allocation2] sm:$0xff] }
 0x1fb   : > { %v1089_v4 = vmul.f32 %v1073_v23, %v879_v62  ;;  %v1088_v44 = vmul.f32 %v1072_v38, %v878_v0  ;;  %2201 = vlog2.f32 %v1114_v59  ;;  %v1119_v27 = vmax.f32 %v1103_v42, 1e-12  ;;  %v2830_v42 = vld [vmem:[#allocation2 + $0x8] sm:$0xff] }
 0x1fc   : > { %v969_v5 = vpop.permute.xlu0 %968  ;;  %v965_v13 = vpop.permute.xlu1 %964  ;;  %2203 = vlog2.f32 %v1117_v40  ;;  %v1118_v43 = vmax.f32 %v1102_v22, 1e-12  ;;  %v1157_v55 = vmul.f32 0.6, %v1127_v53  ;;  %v1309_v59 = vcombine.high %v2676_v7, %v2676_v7 }
 0x1fd   : > { %v1075_v15 = vmul.f32 %v1051_v1, %v969_v5  ;;  %v1074_v51 = vmul.f32 %v1051_v1, %v965_v13  ;;  %v1105_v31 = vadd.f32 1.0, %v1089_v4  ;;  %2205 = vlog2.f32 %v1116_v61 }
 0x1fe   : > { %v1104_v32 = vadd.f32 1.0, %v1088_v44  ;;  %2207 = vlog2.f32 %v1119_v27  ;;  %v1174_v37 = vmul.f32 1.442695, %v1157_v55  ;;  %v1316_v44 = vrot.slane %v2676_v7, %v2717_v35 }
 0x1ff   : > { %v1091_v46 = vmul.f32 %v1075_v15, %v881_v54  ;;  %v1090_v28 = vmul.f32 %v1074_v51, %v880_v18  ;;  %v1121_v45 = vmax.f32 %v1105_v31, 1e-12  ;;  %2209 = vlog2.f32 %v1118_v43 }
 0x200   : > { %v1120_v60 = vmax.f32 %v1104_v32, 1e-12  ;;  %v1324_v20 = vcombine.high %v1316_v44, %v1316_v44  ;;  %v1332_v36 = vrot.slane %v1316_v44, %v2717_v35 }
 0x201   : > { %v2190_v41 = vpop.eup %2189  ;;  %v1107_v58 = vadd.f32 1.0, %v1091_v46  ;;  %v1106_v56 = vadd.f32 1.0, %v1090_v28  ;;  %2211 = vlog2.f32 %v1121_v45  ;;  %v2838_v45 = vrot.slane %v1309_v59, %v2717_v35 }
 0x202   : > { %v2192_v57 = vpop.eup %2191  ;;  %v1125_v49 = vmul.f32 0.6931472, %v2190_v41  ;;  %2213 = vlog2.f32 %v1120_v60  ;;  %v2835_v61 = vrot.slane %v1324_v20, %v2717_v35  ;;  %v1354_v43 = vcombine.high %v1332_v36, %v1332_v36 }
 0x203   : > { %v1131_v21 = vmul.f32 0.6931472, %v2192_v57  ;;  %v1123_v38 = vmax.f32 %v1107_v58, 1e-12  ;;  %v1122_v2 = vmax.f32 %v1106_v56, 1e-12  ;;  %v1361_v55 = vrot.slane %v1332_v36, %v2560_v9 }
 0x204   : > { %v2194_v47 = vpop.eup %2193  ;;  %v1156_v62 = vmul.f32 0.6, %v1125_v49  ;;  %v1365_v56 = vrot.slane %v2835_v61, %v2560_v9 }
 0x205   : > { %v2196_v26 = vpop.eup %2195  ;;  %v1129_v63 = vmul.f32 0.6931472, %v2194_v47  ;;  %v1159_v0 = vmul.f32 0.6, %v1131_v21  ;;  %2215 = vlog2.f32 %v1123_v38 }
 0x206   : > { %v2198_v23 = vpop.eup %2197  ;;  %v1135_v1 = vmul.f32 0.6931472, %v2196_v26  ;;  %v1172_v4 = vmul.f32 1.442695, %v1156_v62  ;;  %2217 = vpow2.f32 %v1174_v37 }
 0x207   : > { %v2200_v6 = vpop.eup %2199  ;;  %v1158_v5 = vmul.f32 0.6, %v1129_v63  ;;  %v1133_v13 = vmul.f32 0.6931472, %v2198_v23  ;;  %v1178_v15 = vmul.f32 1.442695, %v1159_v0  ;;  %2219 = vlog2.f32 %v1122_v2 }
 0x208   : > { %v2202_v3 = vpop.eup %2201  ;;  %v1161_v25 = vmul.f32 0.6, %v1135_v1  ;;  %v1139_v16 = vmul.f32 0.6931472, %v2200_v6  ;;  %2221 = vpow2.f32 %v1172_v4  ;;  %v1369_v1 = vrot.slane %v1354_v43, %v2560_v9 }
 0x209   : > { %v2204_v14 = vpop.eup %2203  ;;  %v1176_v54 = vmul.f32 1.442695, %v1158_v5  ;;  %v1160_v18 = vmul.f32 0.6, %v1133_v13  ;;  %v1137_v19 = vmul.f32 0.6931472, %v2202_v3  ;;  %2223 = vpow2.f32 %v1178_v15 }
 0x20a   : > { %v2206_v51 = vpop.eup %2205  ;;  %v1143_v52 = vmul.f32 0.6931472, %v2204_v14  ;;  %v1182_v11 = vmul.f32 1.442695, %v1161_v25  ;;  %v1163_v28 = vmul.f32 0.6, %v1139_v16 }
 0x20b   : > { %v2208_v46 = vpop.eup %2207  ;;  %v1141_v29 = vmul.f32 0.6931472, %v2206_v51  ;;  %2225 = vpow2.f32 %v1176_v54  ;;  %v1180_v24 = vmul.f32 1.442695, %v1160_v18  ;;  %v1162_v30 = vmul.f32 0.6, %v1137_v19 }
 0x20c   : > { %v2210_v50 = vpop.eup %2209  ;;  %v1165_v39 = vmul.f32 0.6, %v1143_v52  ;;  %v1147_v17 = vmul.f32 0.6931472, %v2208_v46  ;;  %2227 = vpow2.f32 %v1182_v11  ;;  %v1186_v22 = vmul.f32 1.442695, %v1163_v28 }
 0x20d   : > { %v1164_v41 = vmul.f32 0.6, %v1141_v29  ;;  %v1145_v27 = vmul.f32 0.6931472, %v2210_v50  ;;  %2229 = vpow2.f32 %v1180_v24  ;;  %v1184_v53 = vmul.f32 1.442695, %v1162_v30 }
 0x20e   : > { %v2212_v40 = vpop.eup %2211  ;;  %v1190_v32 = vmul.f32 1.442695, %v1165_v39  ;;  %v1167_v57 = vmul.f32 0.6, %v1147_v17  ;;  %2231 = vpow2.f32 %v1186_v22  ;;  %v1356_v30 = vcombine.high %v2835_v61, %v2835_v61 }
 0x20f   : > { %v2214_v31 = vpop.eup %2213  ;;  %v1151_v7 = vmul.f32 0.6931472, %v2212_v40  ;;  %v1188_v62 = vmul.f32 1.442695, %v1164_v41  ;;  %v1166_v63 = vmul.f32 0.6, %v1145_v27  ;;  %2233 = vpow2.f32 %v1184_v53 }
 0x210   : > { %v1149_v23 = vmul.f32 0.6931472, %v2214_v31  ;;  %2235 = vpow2.f32 %v1190_v32  ;;  %v1194_v6 = vmul.f32 1.442695, %v1167_v57  ;;  %v1339_v41 = vrot.slane %v2838_v45, %v2717_v35 }
 0x211   : > { %v1169_v4 = vmul.f32 0.6, %v1151_v7  ;;  %2237 = vpow2.f32 %v1188_v62  ;;  %v1192_v16 = vmul.f32 1.442695, %v1166_v63  ;;  %v1373_v7 = vrot.slane %v1356_v30, %v2560_v9 }
 0x212   : > { %v2216_v58 = vpop.eup %2215  ;;  %v1168_v51 = vmul.f32 0.6, %v1149_v23  ;;  %2239 = vpow2.f32 %v1194_v6 }
 0x213   : > { %v2218_v26 = vpop.eup %2217  ;;  %v1155_v5 = vmul.f32 0.6931472, %v2216_v58  ;;  %v1198_v28 = vmul.f32 1.442695, %v1169_v4  ;;  %2241 = vpow2.f32 %v1192_v16  ;;  %v1325_v58 = vcombine.high %v2838_v45, %v2838_v45 }
 0x214   : > { %v2220_v38 = vpop.eup %2219  ;;  %v1196_v40 = vmul.f32 1.442695, %v1168_v51 }
 0x215   : > { %v2222_v2 = vpop.eup %2221  ;;  %v1153_v54 = vmul.f32 0.6931472, %v2220_v38  ;;  %v1171_v29 = vmul.f32 0.6, %v1155_v5  ;;  %2243 = vpow2.f32 %v1198_v28  ;;  %v1353_v6 = vrot.slane %v1325_v58, %v2717_v35 }
 0x216   : > { %v2224_v18 = vpop.eup %2223  ;;  %2245 = vpow2.f32 %v1196_v40 }
 0x217   : > { %v1170_v22 = vmul.f32 0.6, %v1153_v54  ;;  %v1202_v57 = vmul.f32 1.442695, %v1171_v29  ;;  %v1381_v54 = vrot.slane %v1353_v6, %v2560_v9  ;;  %v1357_v40 = vcombine.high %v1353_v6, %v1353_v6 }
 0x218   : > { %v2226_v11 = vpop.eup %2225 }
 0x219   : > { %v2228_v27 = vpop.eup %2227  ;;  %2247 = vpow2.f32 %v1202_v57 }
 0x21a   : > { %v2230_v61 = vpop.eup %2229 }
 0x21b   : > { %v2232_v62 = vpop.eup %2231 }
 0x225   : > { %v1214_v49 = vpop.permute.xlu0 %1213  ;;  %v1210_v47 = vpop.permute.xlu1 %1209 }
 0x226   : > { %v1293_v21 = vmul.f32 %v1214_v49, %v2830_v42  ;;  %v1292_v60 = vmul.f32 %v1210_v47, %v2832_v48 }
 0x228   : > { %v1399_v37 = vmul.f32 %v1361_v55, %v1293_v21  ;;  %v1398_v0 = vmul.f32 %v1361_v55, %v1292_v60 }
 0x229   : > { %v1225_v13 = vpop.permute.xlu0 %1224  ;;  %v1221_v3 = vpop.permute.xlu1 %1220 }
 0x22a   : > { %v1295_v14 = vmul.f32 %v1225_v13, %v2830_v42  ;;  %v1294_v44 = vmul.f32 %v1221_v3, %v2832_v48  ;;  %v1415_v15 = vmul.f32 %v2218_v26, %v1399_v37  ;;  %v1414_v25 = vmul.f32 %v2222_v2, %v1398_v0  ;;  %v2234_v0 = vpop.eup %2233 }
 0x22b   : > { %v1200_v26 = vmul.f32 1.442695, %v1170_v22  ;;  %v2236_v4 = vpop.eup %2235 }
 0x22c   : > { %v1401_v19 = vmul.f32 %v1365_v56, %v1295_v14  ;;  %v1400_v52 = vmul.f32 %v1365_v56, %v1294_v44  ;;  %v1433_v46 = vsel %vm653_vm0, %v1415_v15, 0.0  ;;  %v1430_v20 = vsel %vm653_vm0, %v1414_v25, 0.0  ;;  %v2238_v44 = vpop.eup %2237 }
 0x22d   : > { %1434 = vadd.xlane.f32.xlu0 %v1433_v46  ;;  %v1236_v50 = vpop.permute.xlu0 %1235  ;;  %1431 = vadd.xlane.f32.xlu1 %v1430_v20  ;;  %v1232_v24 = vpop.permute.xlu1 %1231  ;;  %2249 = vpow2.f32 %v1200_v26 }
 0x22e   : > { %v1297_v36 = vmul.f32 %v1236_v50, %v2830_v42  ;;  %v1296_v39 = vmul.f32 %v1232_v24, %v2832_v48  ;;  %v1417_v17 = vmul.f32 %v2224_v18, %v1401_v19  ;;  %v1416_v59 = vmul.f32 %v2226_v11, %v1400_v52  ;;  %v2240_v52 = vpop.eup %2239 }
 0x22f   : > { %v1355_v19 = vcombine.high %v1339_v41, %v1339_v41  ;;  %v2242_v29 = vpop.eup %2241 }
 0x230   : > { %v1403_v31 = vmul.f32 %v1369_v1, %v1297_v36  ;;  %v1402_v53 = vmul.f32 %v1369_v1, %v1296_v39  ;;  %v1439_v43 = vsel %vm653_vm0, %v1417_v17, 0.0  ;;  %v1436_v32 = vsel %vm653_vm0, %v1416_v59, 0.0  ;;  %v2244_v22 = vpop.eup %2243 }
 0x231   : > { %v1247_v49 = vpop.permute.xlu0 %1246  ;;  %1440 = vadd.xlane.f32.xlu1 %v1439_v43  ;;  %1437 = vadd.xlane.f32.xlu0 %v1436_v32  ;;  %v1243_v47 = vpop.permute.xlu1 %1242  ;;  %v1377_v1 = vrot.slane %v1339_v41, %v2560_v9  ;;  %v1385_v39 = vrot.slane %v1355_v19, %v2560_v9 }
 0x232   : > { %v1299_v55 = vmul.f32 %v1247_v49, %v2830_v42  ;;  %v1298_v21 = vmul.f32 %v1243_v47, %v2832_v48  ;;  %v1419_v60 = vmul.f32 %v2228_v27, %v1403_v31  ;;  %v1418_v56 = vmul.f32 %v2230_v61, %v1402_v53  ;;  %v2246_v43 = vpop.eup %2245 }
 0x233   : > { %v1389_v49 = vrot.slane %v1357_v40, %v2560_v9 }
 0x234   : > { %v1405_v63 = vmul.f32 %v1373_v7, %v1299_v55  ;;  %v1404_v23 = vmul.f32 %v1373_v7, %v1298_v21  ;;  %v1445_v38 = vsel %vm653_vm0, %v1419_v60, 0.0  ;;  %v1442_v37 = vsel %vm653_vm0, %v1418_v56, 0.0  ;;  %v2248_v55 = vpop.eup %2247 }
 0x235   : > { %v1258_v45 = vpop.permute.xlu0 %1257  ;;  %1446 = vadd.xlane.f32.xlu1 %v1445_v38  ;;  %1443 = vadd.xlane.f32.xlu0 %v1442_v37  ;;  %v1254_v2 = vpop.permute.xlu1 %1253 }
 0x236   : > { %v1301_v5 = vmul.f32 %v1258_v45, %v2830_v42  ;;  %v1300_v13 = vmul.f32 %v1254_v2, %v2832_v48  ;;  %v1421_v3 = vmul.f32 %v2232_v62, %v1405_v63  ;;  %v1420_v14 = vmul.f32 %v2234_v0, %v1404_v23 }
 0x238   : > { %v1407_v15 = vmul.f32 %v1377_v1, %v1301_v5  ;;  %v1406_v25 = vmul.f32 %v1377_v1, %v1300_v13  ;;  %v1451_v16 = vsel %vm653_vm0, %v1421_v3, 0.0  ;;  %v1448_v51 = vsel %vm653_vm0, %v1420_v14, 0.0 }
 0x239   : > { %v1269_v18 = vpop.permute.xlu0 %1268  ;;  %1452 = vadd.xlane.f32.xlu1 %v1451_v16  ;;  %1449 = vadd.xlane.f32.xlu0 %v1448_v51  ;;  %v1265_v35 = vpop.permute.xlu1 %1264 }
 0x23a   : > { %v1303_v46 = vmul.f32 %v1269_v18, %v2830_v42  ;;  %v1302_v20 = vmul.f32 %v1265_v35, %v2832_v48  ;;  %v1423_v11 = vmul.f32 %v2236_v4, %v1407_v15  ;;  %v1422_v28 = vmul.f32 %v2238_v44, %v1406_v25  ;;  %v2250_v62 = vpop.eup %2249 }
 0x23b   : > { %v1498_v15 = vadd.s32 4294967288, %v2593_v34 }
 0x23c   : > { %v1409_v50 = vmul.f32 %v1381_v54, %v1303_v46  ;;  %v1408_v24 = vmul.f32 %v1381_v54, %v1302_v20  ;;  %v1457_v30 = vsel %vm653_vm0, %v1423_v11, 0.0  ;;  %v1454_v36 = vsel %vm653_vm0, %v1422_v28, 0.0 }
 0x23d   : > { %v1280_v17 = vpop.permute.xlu0 %1279  ;;  %1458 = vadd.xlane.f32.xlu1 %v1457_v30  ;;  %1455 = vadd.xlane.f32.xlu0 %v1454_v36  ;;  %v1276_v59 = vpop.permute.xlu1 %1275  ;;  %v1501_v51 = vsub.s32 %v1498_v15, %v2557_v8  ;;  %v1496_v54 = vsub.s32 %v2593_v34, %v2557_v8 }
 0x23e   : > { %v1305_v41 = vmul.f32 %v1280_v17, %v2830_v42  ;;  %v1304_v27 = vmul.f32 %v1276_v59, %v2832_v48  ;;  %v1425_v31 = vmul.f32 %v2240_v52, %v1409_v50  ;;  %v1424_v53 = vmul.f32 %v2242_v29, %v1408_v24 }
 0x240   : > { %v1411_v32 = vmul.f32 %v1385_v39, %v1305_v41  ;;  %v1410_v61 = vmul.f32 %v1385_v39, %v1304_v27  ;;  %v1463_v57 = vsel %vm653_vm0, %v1425_v31, 0.0  ;;  %v1460_v7 = vsel %vm653_vm0, %v1424_v53, 0.0 }
 0x241   : > { %v1291_v47 = vpop.permute.xlu0 %1290  ;;  %1464 = vadd.xlane.f32.xlu1 %v1463_v57  ;;  %1461 = vadd.xlane.f32.xlu0 %v1460_v7  ;;  %v1287_v58 = vpop.permute.xlu1 %1286 }
 0x242   : > { %v1307_v21 = vmul.f32 %v1291_v47, %v2830_v42  ;;  %v1306_v60 = vmul.f32 %v1287_v58, %v2832_v48  ;;  %v1427_v56 = vmul.f32 %v2244_v22, %v1411_v32  ;;  %v1426_v26 = vmul.f32 %v2246_v43, %v1410_v61 }
 0x243   : > { %v654_v42 = vsel %vm653_vm0, %v2678_v10, 0.0 }
 0x244   : > { %v1413_v63 = vmul.f32 %v1389_v49, %v1307_v21  ;;  %v1412_v23 = vmul.f32 %v1389_v49, %v1306_v60  ;;  %v1469_v38 = vsel %vm653_vm0, %v1427_v56, 0.0  ;;  %v1466_v37 = vsel %vm653_vm0, %v1426_v26, 0.0 }
 0x245   : > { %1470 = vadd.xlane.f32.xlu1 %v1469_v38  ;;  %1467 = vadd.xlane.f32.xlu0 %v1466_v37  ;;  %v1590_v38 = vld [vmem:[#allocation5 + $0x10] sm:$0xff]  ;;  %v1589_v37 = vld [vmem:[#allocation5 + $0x8] sm:$0xff] }
 0x246   : > { %v1429_v0 = vmul.f32 %v2248_v55, %v1413_v63  ;;  %v1428_v1 = vmul.f32 %v2250_v62, %v1412_v23  ;;  %v1592_v62 = vld [vmem:[#allocation5 + $0x20] sm:$0xff]  ;;  %v2394_v63 = vmov 0.0   ;;  %v1591_v23 = vld [vmem:[#allocation5 + $0x18] sm:$0xff] }
 0x247   : > { %2068 = vmatprep.subr.mxu0 %v2394_v63  ;;  %2078 = vmatprep.mubr.msk.f32.mxu0 %vm2395_vm10, %v2394_v63 }
 0x248   : > { %v1475_v45 = vsel %vm653_vm0, %v1429_v0, 0.0  ;;  %v1472_v2 = vsel %vm653_vm0, %v1428_v1, 0.0  ;;  %2069 = vmatpush3.msra.mxu0 %v1592_v62  ;;  %v1588_v0 = vld [vmem:[#allocation5] sm:$0xff]  ;;  %v1586_v1 = vld [vmem:[%s2993_s4] sm:$0x3] }
 0x249   : > { %1476 = vadd.xlane.f32.xlu1 %v1475_v45  ;;  %1473 = vadd.xlane.f32.xlu0 %v1472_v2  ;;  %v1604_v45 = vrot.slane %v1586_v1, %v2569_v12  ;;  %v1599_v2 = vrot.slane %v1586_v1, %v2560_v9 }
 0x24a   : > { %2070 = vmatprep.subr.mxu0 %v2394_v63 }
 0x24b   : > { %2071 = vmatpush3.msra.mxu0 %v1591_v23 }
 0x24c   : > { %2072 = vmatprep.subr.mxu0 %v2394_v63 }
 0x24d   : > { %655 = vadd.xlane.f32.xlu0 %v654_v42  ;;  %2073 = vmatpush3.msra.mxu0 %v1590_v38 }
 0x24e   : > { %2074 = vmatprep.subr.mxu0 %v2394_v63 }
 0x24f   : > { %2075 = vmatpush3.msra.mxu0 %v1589_v37 }
 0x250   : > { %2076 = vmatprep.subr.mxu0 %v2394_v63 }
 0x251   : > { %2077 = vmatpush3.msra.mxu0 %v1588_v0 }
 0x2b6   : > { %v1435_v48 = vpop.xlane.xlu0 %1434  ;;  %v1432_v6 = vpop.xlane.xlu1 %1431 }
 0x2b7   : > { %v1502_v20 = vrot.slane %v1435_v48, %v1501_v51  ;;  %v1497_v11 = vrot.slane %v1432_v6, %v1496_v54 }
 0x2b9   : > { %v1504_v59 = vsel %vm1503_vm2, %v1502_v20, %v1497_v11  ;;  %v2042_v20 = vld [vmem:[%s2998_s9] ss:$0 sm:$0xff] }
 0x2ba   : > { %v1438_v4 = vpop.xlane.xlu0 %1437  ;;  %v1441_v5 = vpop.xlane.xlu1 %1440 }
 0x2bb   : > { %v1508_v18 = vrot.slane %v1438_v4, %v1496_v54  ;;  %v1512_v10 = vrot.slane %v1441_v5, %v1501_v51  ;;  %v2038_v5 = vld [vmem:[%s2994_s5] ss:$0 sm:$0xff] }
 0x2bd   : > { %v1513_v30 = vsel %vm1503_vm2, %v1512_v10, %v1508_v18 }
 0x2be   : > { %v1444_v13 = vpop.xlane.xlu0 %1443  ;;  %v1447_v3 = vpop.xlane.xlu1 %1446  ;;  %v1569_v27 = vsel %vm1568_vm3, %v1513_v30, %v1504_v59 }
 0x2bf   : > { %v1517_v35 = vrot.slane %v1444_v13, %v1496_v54  ;;  %v1521_v19 = vrot.slane %v1447_v3, %v1501_v51 }
 0x2c1   : > { %v1522_v8 = vsel %vm1503_vm2, %v1521_v19, %v1517_v35  ;;  %v2041_v35 = vld [vmem:[%s2997_s8] ss:$0 sm:$0xff] }
 0x2c2   : > { %v1450_v14 = vpop.xlane.xlu0 %1449  ;;  %v1453_v44 = vpop.xlane.xlu1 %1452  ;;  %v1571_v53 = vsel %vm1570_vm4, %v1522_v8, %v1569_v27 }
 0x2c3   : > { %v1526_v28 = vrot.slane %v1450_v14, %v1496_v54  ;;  %v1530_v29 = vrot.slane %v1453_v44, %v1501_v51 }
 0x2c5   : > { %v1531_v40 = vsel %vm1503_vm2, %v1530_v29, %v1526_v28 }
 0x2c6   : > { %v1456_v25 = vpop.xlane.xlu0 %1455  ;;  %v1459_v16 = vpop.xlane.xlu1 %1458  ;;  %v1573_v32 = vsel %vm1572_vm5, %v1531_v40, %v1571_v53 }
 0x2c7   : > { %v1535_v50 = vrot.slane %v1456_v25, %v1496_v54  ;;  %v1539_v24 = vrot.slane %v1459_v16, %v1501_v51  ;;  %v2039_v25 = vld [vmem:[%s2996_s7] ss:$0 sm:$0xff] }
 0x2c9   : > { %v1540_v31 = vsel %vm1503_vm2, %v1539_v24, %v1535_v50 }
 0x2ca   : > { %v1462_v52 = vpop.xlane.xlu0 %1461  ;;  %v1465_v46 = vpop.xlane.xlu1 %1464  ;;  %v1575_v49 = vsel %vm1574_vm6, %v1540_v31, %v1573_v32 }
 0x2cb   : > { %v1544_v36 = vrot.slane %v1462_v52, %v1496_v54  ;;  %v1548_v39 = vrot.slane %v1465_v46, %v1501_v51 }
 0x2cd   : > { %v1549_v43 = vsel %vm1503_vm2, %v1548_v39, %v1544_v36 }
 0x2ce   : > { %v1468_v34 = vpop.xlane.xlu0 %1467  ;;  %v1471_v17 = vpop.xlane.xlu1 %1470  ;;  %v1577_v55 = vsel %vm1576_vm7, %v1549_v43, %v1575_v49 }
 0x2cf   : > { %v1553_v22 = vrot.slane %v1468_v34, %v1496_v54  ;;  %v1557_v41 = vrot.slane %v1471_v17, %v1501_v51 }
 0x2d1   : > { %v1558_v61 = vsel %vm1503_vm2, %v1557_v41, %v1553_v22 }
 0x2d2   : > { %v1474_v57 = vpop.xlane.xlu0 %1473  ;;  %v1477_v7 = vpop.xlane.xlu1 %1476  ;;  %v1579_v60 = vsel %vm1578_vm8, %v1558_v61, %v1577_v55 }
 0x2d3   : > { %v1562_v47 = vrot.slane %v1474_v57, %v1496_v54  ;;  %v1566_v58 = vrot.slane %v1477_v7, %v1501_v51 }
 0x2d5   : > { %v1567_v21 = vsel %vm1503_vm2, %v1566_v58, %v1562_v47 }
 0x2d6   : > { %v1581_v56 = vsel %vm1580_vm9, %v1567_v21, %v1579_v60  ;;  %v656_v42 = vpop.xlane.xlu0 %655 }
 0x2d7   : > { %v1583_v26 = vsel %vm653_vm0, %v1581_v56, 0.0  ;;  %v1605_v6 = vmul.f32 %v1604_v45, %v656_v42 }
 0x2d8   : > { %1584 = vadd.xlane.f32.xlu1 %v1583_v26 }
 0x361   : > { %v1585_v48 = vpop.xlane.xlu1 %1584 }
 0x362   : > { %v1600_v4 = vmul.f32 %v1599_v2, %v1585_v48 }
 0x364   : > { %v1606_v13 = vadd.f32 %v1605_v6, %v1600_v4 }
 0x366   : > { %v1613_v3 = vadd.f32 %v2038_v5, %v1606_v13 }
 0x368   : > { %v1614_v14 = vmul.f32 %v1613_v3, %v1613_v3 }
 0x36a   : > { %v1615_v44 = vadd.f32 1.0, %v1614_v14 }
 0x36c   : > { %2251 = vrcp.f32 %v1615_v44 }
 0x379   : > { %v2252_v15 = vpop.eup %2251 }
 0x37a   : > { %2079 = vmatmul.mubr.msk.f32.vlgmr.msra.gmra.mxu0 %vm1624_vm11, %v2252_v15 }
 0x43a   : > { %v1694_v16 = vpop.f32.mrf.mxu0 }
 0x43b   : > { %v1695_v51 = vadd.f32 %v2039_v25, %v1694_v16 }
 0x43c   : > { %v2080_v54 = vpop.f32.mrf.mxu0 }
 0x43d   : > { %v1698_v18 = vmul.f32 %v1695_v51, %v1695_v51 }
 0x43f   : > { %v1699_v10 = vadd.f32 1.0, %v1698_v18 }
 0x441   : > { %2253 = vrcp.f32 %v1699_v10 }
 0x44e   : > { %v2254_v19 = vpop.eup %2253 }
 0x44f   : > { %v1708_v52 = vmul.f32 %v2254_v19, %v2041_v35 }
 0x451   : > { %v1709_v46 = vsel %vm1624_vm11, %v1708_v52, 0.0 }
 0x452   : > { %1710 = vadd.xlane.f32.xlu0 %v1709_v46 }
 0x4db   : > { %v1711_v11 = vpop.xlane.xlu0 %1710 }
 0x4dc   : > { %v1718_v28 = vadd.f32 %v2042_v20, %v1711_v11 }
 0x4de   : > { %1719 = vxpose.xlu1.b32.start.end [1/1] (short) (narrow) %v1718_v28, 8 }
 0x557   : > { %1759 = sbr.rel (%p2553_p8) target bundleno = 1882 (0x75a), region = 72 }
 0x55a   : > { %v1735_v29 = vpop.trf.xlu1 }
 0x55b   : > { %1752 = vst.msk [vmem:[%s2925_s12] sm:$0x1] %vm1751_vm12, %v1735_v29 }
 0x55c   : > { %v1769_v50 = vld [vmem:[#allocation5 + $0x48] sm:$0xff]  ;;  %v2396_v24 = vmov 0.0   ;;  %v1768_v30 = vld [vmem:[#allocation5 + $0x40] sm:$0xff]  ;;  %vm2397_vm13 = vmmov 0   ;;  %v2043_v36 = vld [vmem:[%s2993_s4 + $0x2] sm:$0x3] }
 0x55d   : > { %2081 = vmatprep.subr.mxu0 %v2396_v24  ;;  %2091 = vmatprep.mubr.msk.f32.mxu0 %vm2397_vm13, %v2396_v24  ;;  %v1779_v39 = vrot.slane %v2043_v36, %v2560_v9  ;;  %v1784_v8 = vrot.slane %v2043_v36, %v2569_v12  ;;  %v1767_v34 = vld [vmem:[#allocation5 + $0x38] sm:$0xff]  ;;  %v1766_v40 = vld [vmem:[#allocation5 + $0x30] sm:$0xff]  ;;  %v1765_v27 = vld [vmem:[#allocation5 + $0x28] sm:$0xff]  ;;  %vm1898_vm14 = vcmp.eq.s32.totalorder %v2591_v33, 8 }
 0x55e   : > { %2082 = vmatpush3.msra.mxu0 %v1769_v50  ;;  %v2048_v22 = vld [vmem:[%s2994_s5 + $0x1] ss:$0 sm:$0xff] }
 0x55f   : > { %2083 = vmatprep.subr.mxu0 %v2396_v24  ;;  %v1780_v17 = vmul.f32 %v1779_v39, %v1585_v48  ;;  %v1785_v59 = vmul.f32 %v1784_v8, %v656_v42  ;;  %v2049_v43 = vld [vmem:[%s2996_s7 + $0x1] ss:$0 sm:$0xff] }
 0x560   : > { %2084 = vmatpush3.msra.mxu0 %v1768_v30  ;;  %v2051_v47 = vld [vmem:[%s2997_s8 + $0x1] ss:$0 sm:$0xff] }
 0x561   : > { %2085 = vmatprep.subr.mxu0 %v2396_v24  ;;  %v1786_v41 = vadd.f32 %v1785_v59, %v1780_v17  ;;  %v2052_v60 = vld [vmem:[%s2998_s9 + $0x1] ss:$0 sm:$0xff] }
 0x562   : > { %2086 = vmatpush3.msra.mxu0 %v1767_v34 }
 0x563   : > { %2087 = vmatprep.subr.mxu0 %v2396_v24  ;;  %v1793_v31 = vadd.f32 %v2048_v22, %v1786_v41 }
 0x564   : > { %2088 = vmatpush3.msra.mxu0 %v1766_v40 }
 0x565   : > { %2089 = vmatprep.subr.mxu0 %v2396_v24  ;;  %v1794_v9 = vmul.f32 %v1793_v31, %v1793_v31 }
 0x566   : > { %2090 = vmatpush3.msra.mxu0 %v1765_v27 }
 0x567   : > { %v1795_v12 = vadd.f32 1.0, %v1794_v9 }
 0x569   : > { %2255 = vrcp.f32 %v1795_v12 }
 0x576   : > { %v2256_v53 = vpop.eup %2255 }
 0x577   : > { %2092 = vmatmul.mubr.msk.f32.vlgmr.msra.gmra.mxu0 %vm1624_vm11, %v2256_v53 }
 0x637   : > { %v1873_v32 = vpop.f32.mrf.mxu0 }
 0x638   : > { %v1874_v61 = vadd.f32 %v2049_v43, %v1873_v32 }
 0x639   : > { %v2093_v57 = vpop.f32.mrf.mxu0 }
 0x63a   : > { %v1877_v7 = vmul.f32 %v1874_v61, %v1874_v61 }
 0x63c   : > { %v1878_v49 = vadd.f32 1.0, %v1877_v7 }
 0x63e   : > { %2257 = vrcp.f32 %v1878_v49 }
 0x64b   : > { %v2258_v58 = vpop.eup %2257 }
 0x64c   : > { %v1887_v55 = vmul.f32 %v2258_v58, %v2051_v47 }
 0x64e   : > { %v1888_v21 = vsel %vm1624_vm11, %v1887_v55, 0.0 }
 0x64f   : > { %1889 = vadd.xlane.f32.xlu0 %v1888_v21 }
 0x6d8   : > { %v1890_v56 = vpop.xlane.xlu0 %1889 }
 0x6d9   : > { %v1897_v26 = vadd.f32 %v2052_v60, %v1890_v56 }
 0x6db   : > { %v1899_v62 = vsel %vm1898_vm14, %v1897_v26, %v1718_v28 }
 0x6dc   : > { %1900 = vxpose.xlu0.b32.start.end [1/1] (short) (narrow) %v1899_v62, 8 }
 0x758   : > { %v1916_v63 = vpop.trf.xlu0 }
 0x759   : > { %1932 = vst.msk [vmem:[%s2925_s12] sm:$0x1] %vm1751_vm12, %v1916_v63 }
 0x75a PF: > { %s2053_s20 = sshll.u32 %s2475_s17, 4  ;;  %s1946_s11 = sshll.u32 %s2925_s12, 4  ;;  %s1947_s11 = int_to_ptr.vmem [resolvable:$true] %s1946_s11 }
 0x75b   : > { %s1944_s29 = scalar_lea.hbm %s2999_s10, %s2053_s20  ;;  %s1934_s27 = scalar_lea.sflag [#allocation4], %s378_s30 }
 0x75c   : > { %s2311_s28 = scalar_lea.vmem %s1947_s11, 16  ;;  %s2398_s25 = smov [#allocation7]  }
 0x75d   : > { %p2312_p11 = scmp.ne.s32.totalorder %s1947_s11, %s2311_s28  ;;  %s2315_s18 = sshll.u32 %s2398_s25, 4  ;;  %s2316_s18 = int_to_ptr.vmem [resolvable:$false] %s2315_s18 }
 0x75e   : > { %s2317_s0 = scalar_lea.vmem %s2316_s18, 32  ;;  %p2318_p3 = scmp.lt.s32.totalorder %s1947_s11, %s2316_s18 }
 0x75f   : > { %p2313_p0 = pnand %p2312_p11, %p2492_p5  ;;  %p2319_p2 = scmp.lt.s32.totalorder %s2317_s0, %s2311_s28 }
 0x761   : > { %p2314_p1 = pneg %p2313_p0  ;;  %p2320_p4 = por %p2319_p2, %p2318_p3 }
 0x763   : > { %p2321_p13 = pnand %p2320_p4, %p2314_p1 }
 0x765   : > { %2324 = shalt.err (!%p2321_p13)
}
 0x766   : > { %s2325_s17 = scalar_lea.hbm %s1944_s29, 16  ;;  %s2329_s20 = scalar_lea.hbm %s2999_s10, 32 }
 0x767   : > { %p2326_p7 = scmp.ne.s32.totalorder %s1944_s29, %s2325_s17  ;;  %p2330_p10 = scmp.lt.s32.totalorder %s1944_s29, %s2999_s10 }
 0x768   : > { %p2331_p12 = scmp.lt.s32.totalorder %s2329_s20, %s2325_s17 }
 0x769   : > { %p2327_p6 = pnand %p2326_p7, %p2492_p5 }
 0x76a   : > { %p2332_p8 = por %p2331_p12, %p2330_p10 }
 0x76b   : > { %p2328_p9 = pneg %p2327_p6 }
 0x76d   : > { %p2333_p11 = pnand %p2332_p8, %p2328_p9 }
 0x76f   : > { %2336 = shalt.err (!%p2333_p11)
}
 0x770   : > { %2106 = dma.vmem_to_hbm [thread:$0]  (%p2492_p5), %s1947_s11, 16, %s1944_s29, %s1934_s27  }
 0x771 PF: > { %p2123_p0 = scmp.ge.s32.totalorder %s2379_s16, 2  ;;  %s1958_s0 = sand.u32 1, %s2367_s13  }
 0x772   : > { %p3012_p1 = scmp.ne.s32.totalorder %s3003_s24, 0  ;;  %s1959_s28 = scalar_lea.sflag [#allocation4], %s1958_s0 }
 0x774   : > { %p2116_p3 = pnand %p2123_p0, %p3012_p1 }
 0x776   : > { %p2117_p2 = pneg %p2116_p3 }
 0x778   : > { %2362 = dma.done.wait (%p2117_p2), %s1959_s28, 16  }
 0x779   : > { %2364 = vsyncadd (%p2117_p2), %s1959_s28, 4294967280  ;;  %p22_p4 = scmp.ge.s32.totalorder %s2479_s19, 4   ;;  %s3013_s13 = smov %s2371_s14 }
 0x77a   : > { %s3014_s14 = smov %s2375_s15  ;;  %s3015_s15 = smov %s2490_s22 }
 0x77b   : > { %s3016_s16 = smov %s2479_s19  ;;  %24 = sbr.rel (!%p22_p4) target bundleno = 7 (0x7), region = 114 }
 0x780   :  { %1963 = vsyncpa [#allocation3], 1 }
 0x781   :  { %1965 = vsyncpa [#allocation3 + $0x1], 1 }
 0x782   :  { %1966 = vsyncpa [#allocation6], 1 }
 0x783   :  { %1967 = vsyncpa [#allocation4], 1 }
 0x784   :  { %1969 = vsyncpa [#allocation4 + $0x1], 1 }

</bundles_post_ra>
